<compile_context>
chip_gen: v6e
topology: v6e:2x2x1
jax: 0.10.0
libtpu: 0.0.40
codegen_flags: <defaults>
</compile_context>

<pallas_src>
import functools

import jax
import jax.numpy as jnp
from jax.experimental import pallas as pl
from jax.experimental.pallas import tpu as pltpu

LANE = 128


def _round_up(x, m):
    return (x + m - 1) // m * m


# ---------------------------------------------------------------------------
# Pallas kernels
# ---------------------------------------------------------------------------

def _fused_conv12_kernel(p_ref, w1_ref, b1_ref, w2_ref, b2_ref, o_ref,
                         *, compute_dtype):
    # p_ref : (TM, KKC1p)   im2col patches of conv1 (zero-padded contraction)
    # w1_ref: (KKC1p, C1p)  conv1 weights, Cout padded to 128 (zero cols)
    # b1_ref: (1, C1p)
    # w2_ref: (C1p, C2)     conv2 (1x1) weights, padded rows are zero
    # b2_ref: (1, C2)
    # o_ref : (TM, C2)
    p = p_ref[...].astype(compute_dtype)
    w1 = w1_ref[...].astype(compute_dtype)
    h = jnp.dot(p, w1, preferred_element_type=jnp.float32)
    h = jnp.maximum(h + b1_ref[...].astype(jnp.float32), 0.0)      # ReLU, f32
    w2 = w2_ref[...].astype(compute_dtype)
    y = jnp.dot(h.astype(compute_dtype), w2, preferred_element_type=jnp.float32)
    y = jnp.maximum(y + b2_ref[...].astype(jnp.float32), 0.0)      # ReLU, f32
    o_ref[...] = y.astype(o_ref.dtype)


def _conv3_kernel(p_ref, w_ref, b_ref, o_ref, *, compute_dtype):
    # p_ref : (TM, KKCp)    im2col patches of conv3
    # w_ref : (KKCp, C3p)   conv3 weights, Cout padded 3 -> 128 (lane dense)
    # b_ref : (1, C3p)
    # o_ref : (TM, C3p)
    p = p_ref[...].astype(compute_dtype)
    w = w_ref[...].astype(compute_dtype)
    y = jnp.dot(p, w, preferred_element_type=jnp.float32)
    y = y + b_ref[...].astype(jnp.float32)                          # no ReLU
    o_ref[...] = y.astype(o_ref.dtype)


# ---------------------------------------------------------------------------
# Wrappers
# ---------------------------------------------------------------------------

def _im2col(x_nhwc, K, pad):
    """(N,H,W,C) -> (N,H,W,K*K*C); column order (kh, kw, c), c fastest —
    matches reshape of HWIO weights to (K*K*C, Cout)."""
    xp = jnp.pad(x_nhwc, ((0, 0), (pad, pad), (pad, pad), (0, 0)))
    N, Hp, Wp, C = xp.shape
    Ho, Wo = Hp - K + 1, Wp - K + 1
    cols = []
    for kh in range(K):
        for kw in range(K):
            cols.append(xp[:, kh:kh + Ho, kw:kw + Wo, :])
    return jnp.concatenate(cols, axis=-1)


_COMPILER_PARAMS = pltpu.CompilerParams(
    dimension_semantics=("parallel",),
    vmem_limit_bytes=32 * 1024 * 1024,
)


def _fused_conv12(patches, w1, b1, w2, b2, *, tm, compute_dtype):
    """Fused conv1(9x9)+ReLU -> conv2(1x1)+ReLU as two chained matmuls."""
    M, KKC1 = patches.shape
    C1 = w1.shape[1]
    C2 = w2.shape[1]
    KKC1p = _round_up(KKC1, LANE)      # 243 -> 256
    C1p = _round_up(C1, LANE)          # 64  -> 128 (lane-dense hidden)
    Mp = _round_up(M, tm)

    p = jnp.pad(patches, ((0, Mp - M), (0, KKC1p - KKC1)))
    w1p = jnp.pad(w1, ((0, KKC1p - KKC1), (0, C1p - C1)))
    b1p = jnp.pad(b1, (0, C1p - C1)).reshape(1, C1p)
    w2p = jnp.pad(w2, ((0, C1p - C1), (0, 0)))
    b2p = b2.reshape(1, C2)

    out = pl.pallas_call(
        functools.partial(_fused_conv12_kernel, compute_dtype=compute_dtype),
        out_shape=jax.ShapeDtypeStruct((Mp, C2), jnp.float32),
        grid=(Mp // tm,),
        in_specs=[
            pl.BlockSpec((tm, KKC1p), lambda i: (i, 0)),
            pl.BlockSpec((KKC1p, C1p), lambda i: (0, 0)),
            pl.BlockSpec((1, C1p), lambda i: (0, 0)),
            pl.BlockSpec((C1p, C2), lambda i: (0, 0)),
            pl.BlockSpec((1, C2), lambda i: (0, 0)),
        ],
        out_specs=pl.BlockSpec((tm, C2), lambda i: (i, 0)),
        compiler_params=_COMPILER_PARAMS,
    )(p, w1p, b1p, w2p, b2p)
    return out[:M]


def _conv3_matmul(patches, w3, b3, *, tm, compute_dtype):
    """conv3 (5x5, no activation) as a single matmul, lane-dense output."""
    M, KKC = patches.shape
    C3 = w3.shape[1]
    KKCp = _round_up(KKC, LANE)        # 800 -> 896
    C3p = _round_up(C3, LANE)          # 3   -> 128 (lane-dense store)
    Mp = _round_up(M, tm)

    p = jnp.pad(patches, ((0, Mp - M), (0, KKCp - KKC)))
    w = jnp.pad(w3, ((0, KKCp - KKC), (0, C3p - C3)))
    b = jnp.pad(b3, (0, C3p - C3)).reshape(1, C3p)

    out = pl.pallas_call(
        functools.partial(_conv3_kernel, compute_dtype=compute_dtype),
        out_shape=jax.ShapeDtypeStruct((Mp, C3p), jnp.float32),
        grid=(Mp // tm,),
        in_specs=[
            pl.BlockSpec((tm, KKCp), lambda i: (i, 0)),
            pl.BlockSpec((KKCp, C3p), lambda i: (0, 0)),
            pl.BlockSpec((1, C3p), lambda i: (0, 0)),
        ],
        out_specs=pl.BlockSpec((tm, C3p), lambda i: (i, 0)),
        compiler_params=_COMPILER_PARAMS,
    )(p, w, b)
    return out[:M, :C3]


# ---------------------------------------------------------------------------
# Model
# ---------------------------------------------------------------------------

def init_srcnn_params(key, dtype=jnp.float32):
    """Weights stored HWIO (K, K, Cin, Cout), matching torch layer shapes."""
    defs = {"1": (3, 64, 9), "2": (64, 32, 1), "3": (32, 3, 5)}
    params = {}
    for name, (cin, cout, k) in defs.items():
        key, kw, kb = jax.random.split(key, 3)
        scale = 1.0 / jnp.sqrt(jnp.asarray(cin * k * k, jnp.float32))
        params[f"w{name}"] = (
            jax.random.normal(kw, (k, k, cin, cout), jnp.float32) * scale
        ).astype(dtype)
        params[f"b{name}"] = (
            jax.random.normal(kb, (cout,), jnp.float32) * 0.01
        ).astype(dtype)
    return params


def srcnn_forward(params, x_nchw, *, tm=256, compute_dtype=jnp.float32):
    w1, b1 = params["w1"], params["b1"]      # (9,9,3,64), (64,)
    w2, b2 = params["w2"], params["b2"]      # (1,1,64,32), (32,)
    w3, b3 = params["w3"], params["b3"]      # (5,5,32,3), (3,)

    N, _, H, W = x_nchw.shape
    x = jnp.transpose(x_nchw, (0, 2, 3, 1))  # NCHW -> NHWC

    # conv1 (9x9, pad 4) + ReLU, fused with conv2 (1x1) + ReLU.
    K1 = w1.shape[0]
    p1 = _im2col(x, K1, pad=4).reshape(N * H * W, -1)
    y12 = _fused_conv12(
        p1, w1.reshape(-1, w1.shape[-1]), b1,
        w2.reshape(w2.shape[-2], w2.shape[-1]), b2,
        tm=tm, compute_dtype=compute_dtype,
    ).reshape(N, H, W, -1)

    # conv3 (5x5, pad 2), no activation.
    K3 = w3.shape[0]
    p3 = _im2col(y12, K3, pad=2).reshape(N * H * W, -1)
    y3 = _conv3_matmul(
        p3, w3.reshape(-1, w3.shape[-1]), b3,
        tm=tm, compute_dtype=compute_dtype,
    ).reshape(N, H, W, -1)

    return jnp.transpose(y3, (0, 3, 1, 2))   # back to NCHW


def srcnn_reference(params, x_nchw):
    """Pure-JAX reference (lax conv) for correctness checking."""
    x = jnp.transpose(x_nchw, (0, 2, 3, 1))

    def conv(x, w, b, pad, relu):
        y = jax.lax.conv_general_dilated(
            x, w, window_strides=(1, 1),
            padding=((pad, pad), (pad, pad)),
            dimension_numbers=("NHWC", "HWIO", "NHWC"))
        y = y + b
        return jnp.maximum(y, 0.0) if relu else y

    x = conv(x, params["w1"], params["b1"], 4, True)
    x = conv(x, params["w2"], params["b2"], 0, True)
    x = conv(x, params["w3"], params["b3"], 2, False)
    return jnp.transpose(x, (0, 3, 1, 2))


if __name__ == "__main__":
    key = jax.random.PRNGKey(0)
    pkey, xkey = jax.random.split(key)

    params = init_srcnn_params(pkey)
    x = jax.random.normal(xkey, (2, 3, 16, 16), jnp.float32)

    # f32 path (matches torch semantics).
    fwd_f32 = jax.jit(functools.partial(srcnn_forward, compute_dtype=jnp.float32))
    out = jax.block_until_ready(fwd_f32(params, x))
    assert out.shape == (2, 3, 16, 16), out.shape
    assert out.dtype == jnp.float32

    ref = jax.block_until_ready(srcnn_reference(params, x))
    err = float(jnp.max(jnp.abs(out - ref)))
    assert err < 5e-2, f"max abs err vs reference: {err}"

    # bf16 MXU operands / f32 accumulate path (recommended on v6e/v7x).
    fwd_bf16 = jax.jit(functools.partial(srcnn_forward, compute_dtype=jnp.bfloat16))
    out_bf16 = jax.block_until_ready(fwd_bf16(params, x))
    assert out_bf16.shape == (2, 3, 16, 16)

    print("KERNEL_OK")
</pallas_src>

<mosaic_0001>
module attributes {stable_mosaic.version = 11 : i64} {
  func.func @_fused_conv12_kernel(%arg0: i32, %arg1: memref<256x256xf32, #tpu.memory_space<vmem>>, %arg2: memref<256x128xf32, #tpu.memory_space<vmem>>, %arg3: memref<1x128xf32, #tpu.memory_space<vmem>>, %arg4: memref<128x32xf32, #tpu.memory_space<vmem>>, %arg5: memref<1x32xf32, #tpu.memory_space<vmem>>, %arg6: memref<256x32xf32, #tpu.memory_space<vmem>>) attributes {dimension_semantics = [#tpu.dimension_semantics<parallel>], iteration_bounds = array<i64: 2>, scalar_prefetch = 0 : i64, scratch_operands = 0 : i64, tpu.core_type = #tpu.core_type<tc>, window_params = [{transform_indices = @transform_0, window_bounds = array<i64: 256, 256>}, {pipeline_mode = #tpu.pipeline_mode<synchronous>, transform_indices = @transform_1, window_bounds = array<i64: 256, 128>}, {pipeline_mode = #tpu.pipeline_mode<synchronous>, transform_indices = @transform_2, window_bounds = array<i64: 1, 128>}, {pipeline_mode = #tpu.pipeline_mode<synchronous>, transform_indices = @transform_3, window_bounds = array<i64: 128, 32>}, {pipeline_mode = #tpu.pipeline_mode<synchronous>, transform_indices = @transform_4, window_bounds = array<i64: 1, 32>}, {transform_indices = @transform_5, window_bounds = array<i64: 256, 32>}]} {
    %c0 = arith.constant 0 : index
    %c0_0 = arith.constant 0 : index
    %0 = vector.load %arg1[%c0, %c0_0] : memref<256x256xf32, #tpu.memory_space<vmem>>, vector<256x256xf32>
    %c0_1 = arith.constant 0 : index
    %c0_2 = arith.constant 0 : index
    %1 = vector.load %arg2[%c0_1, %c0_2] : memref<256x128xf32, #tpu.memory_space<vmem>>, vector<256x128xf32>
    %cst = arith.constant dense<0.000000e+00> : vector<256x128xf32>
    %2 = tpu.matmul %0, %1, %cst {dimension_numbers = #tpu.dot_dimension_numbers<[1], [0], [0], [1], [0, 0, 1, 1], [], []>} : vector<256x256xf32>, vector<256x128xf32>, vector<256x128xf32> -> vector<256x128xf32>
    %c0_3 = arith.constant 0 : index
    %c0_4 = arith.constant 0 : index
    %3 = vector.load %arg3[%c0_3, %c0_4] : memref<1x128xf32, #tpu.memory_space<vmem>>, vector<1x128xf32>
    %4 = vector.broadcast %3 : vector<1x128xf32> to vector<256x128xf32>
    %5 = arith.addf %2, %4 : vector<256x128xf32>
    %cst_5 = arith.constant 0.000000e+00 : f32
    %6 = vector.broadcast %cst_5 : f32 to vector<256x128xf32>
    %7 = arith.maximumf %5, %6 : vector<256x128xf32>
    %c0_6 = arith.constant 0 : index
    %c0_7 = arith.constant 0 : index
    %8 = vector.load %arg4[%c0_6, %c0_7] : memref<128x32xf32, #tpu.memory_space<vmem>>, vector<128x32xf32>
    %cst_8 = arith.constant dense<0.000000e+00> : vector<256x32xf32>
    %9 = tpu.matmul %7, %8, %cst_8 {dimension_numbers = #tpu.dot_dimension_numbers<[1], [0], [0], [1], [0, 0, 1, 1], [], []>} : vector<256x128xf32>, vector<128x32xf32>, vector<256x32xf32> -> vector<256x32xf32>
    %c0_9 = arith.constant 0 : index
    %c0_10 = arith.constant 0 : index
    %10 = vector.load %arg5[%c0_9, %c0_10] : memref<1x32xf32, #tpu.memory_space<vmem>>, vector<1x32xf32>
    %11 = vector.broadcast %10 : vector<1x32xf32> to vector<256x32xf32>
    %12 = arith.addf %9, %11 : vector<256x32xf32>
    %cst_11 = arith.constant 0.000000e+00 : f32
    %13 = vector.broadcast %cst_11 : f32 to vector<256x32xf32>
    %14 = arith.maximumf %12, %13 : vector<256x32xf32>
    %c0_12 = arith.constant 0 : index
    %c0_13 = arith.constant 0 : index
    %15 = vector.load %arg6[%c0_12, %c0_13] : memref<256x32xf32, #tpu.memory_space<vmem>>, vector<256x32xf32>
    tpu.vector_store %arg6[%c0_12, %c0_13], %14 {strides = array<i32>} : memref<256x32xf32, #tpu.memory_space<vmem>>, vector<256x32xf32>,
    return
  }
  func.func @transform_0(%arg0: i32) -> (i32, i32) {
    %c0_i32 = arith.constant 0 : i32
    %c0_i32_0 = arith.constant 0 : i32
    return %arg0, %c0_i32 : i32, i32
  }
  func.func @transform_1(%arg0: i32) -> (i32, i32) {
    %c0_i32 = arith.constant 0 : i32
    %c0_i32_0 = arith.constant 0 : i32
    %c0_i32_1 = arith.constant 0 : i32
    return %c0_i32, %c0_i32_0 : i32, i32
  }
  func.func @transform_2(%arg0: i32) -> (i32, i32) {
    %c0_i32 = arith.constant 0 : i32
    %c0_i32_0 = arith.constant 0 : i32
    %c0_i32_1 = arith.constant 0 : i32
    return %c0_i32, %c0_i32_0 : i32, i32
  }
  func.func @transform_3(%arg0: i32) -> (i32, i32) {
    %c0_i32 = arith.constant 0 : i32
    %c0_i32_0 = arith.constant 0 : i32
    %c0_i32_1 = arith.constant 0 : i32
    return %c0_i32, %c0_i32_0 : i32, i32
  }
  func.func @transform_4(%arg0: i32) -> (i32, i32) {
    %c0_i32 = arith.constant 0 : i32
    %c0_i32_0 = arith.constant 0 : i32
    %c0_i32_1 = arith.constant 0 : i32
    return %c0_i32, %c0_i32_0 : i32, i32
  }
  func.func @transform_5(%arg0: i32) -> (i32, i32) {
    %c0_i32 = arith.constant 0 : i32
    %c0_i32_0 = arith.constant 0 : i32
    return %arg0, %c0_i32 : i32, i32
  }
}

module attributes {stable_mosaic.version = 11 : i64} {
  func.func @_conv3_kernel(%arg0: i32, %arg1: memref<256x896xf32, #tpu.memory_space<vmem>>, %arg2: memref<896x128xf32, #tpu.memory_space<vmem>>, %arg3: memref<1x128xf32, #tpu.memory_space<vmem>>, %arg4: memref<256x128xf32, #tpu.memory_space<vmem>>) attributes {dimension_semantics = [#tpu.dimension_semantics<parallel>], iteration_bounds = array<i64: 2>, scalar_prefetch = 0 : i64, scratch_operands = 0 : i64, tpu.core_type = #tpu.core_type<tc>, window_params = [{transform_indices = @transform_0, window_bounds = array<i64: 256, 896>}, {pipeline_mode = #tpu.pipeline_mode<synchronous>, transform_indices = @transform_1, window_bounds = array<i64: 896, 128>}, {pipeline_mode = #tpu.pipeline_mode<synchronous>, transform_indices = @transform_2, window_bounds = array<i64: 1, 128>}, {transform_indices = @transform_3, window_bounds = array<i64: 256, 128>}]} {
    %c0 = arith.constant 0 : index
    %c0_0 = arith.constant 0 : index
    %0 = vector.load %arg1[%c0, %c0_0] : memref<256x896xf32, #tpu.memory_space<vmem>>, vector<256x896xf32>
    %c0_1 = arith.constant 0 : index
    %c0_2 = arith.constant 0 : index
    %1 = vector.load %arg2[%c0_1, %c0_2] : memref<896x128xf32, #tpu.memory_space<vmem>>, vector<896x128xf32>
    %cst = arith.constant dense<0.000000e+00> : vector<256x128xf32>
    %2 = tpu.matmul %0, %1, %cst {dimension_numbers = #tpu.dot_dimension_numbers<[1], [0], [0], [1], [0, 0, 1, 1], [], []>} : vector<256x896xf32>, vector<896x128xf32>, vector<256x128xf32> -> vector<256x128xf32>
    %c0_3 = arith.constant 0 : index
    %c0_4 = arith.constant 0 : index
    %3 = vector.load %arg3[%c0_3, %c0_4] : memref<1x128xf32, #tpu.memory_space<vmem>>, vector<1x128xf32>
    %4 = vector.broadcast %3 : vector<1x128xf32> to vector<256x128xf32>
    %5 = arith.addf %2, %4 : vector<256x128xf32>
    %c0_5 = arith.constant 0 : index
    %c0_6 = arith.constant 0 : index
    %6 = vector.load %arg4[%c0_5, %c0_6] : memref<256x128xf32, #tpu.memory_space<vmem>>, vector<256x128xf32>
    tpu.vector_store %arg4[%c0_5, %c0_6], %5 {strides = array<i32>} : memref<256x128xf32, #tpu.memory_space<vmem>>, vector<256x128xf32>,
    return
  }
  func.func @transform_0(%arg0: i32) -> (i32, i32) {
    %c0_i32 = arith.constant 0 : i32
    %c0_i32_0 = arith.constant 0 : i32
    return %arg0, %c0_i32 : i32, i32
  }
  func.func @transform_1(%arg0: i32) -> (i32, i32) {
    %c0_i32 = arith.constant 0 : i32
    %c0_i32_0 = arith.constant 0 : i32
    %c0_i32_1 = arith.constant 0 : i32
    return %c0_i32, %c0_i32_0 : i32, i32
  }
  func.func @transform_2(%arg0: i32) -> (i32, i32) {
    %c0_i32 = arith.constant 0 : i32
    %c0_i32_0 = arith.constant 0 : i32
    %c0_i32_1 = arith.constant 0 : i32
    return %c0_i32, %c0_i32_0 : i32, i32
  }
  func.func @transform_3(%arg0: i32) -> (i32, i32) {
    %c0_i32 = arith.constant 0 : i32
    %c0_i32_0 = arith.constant 0 : i32
    return %arg0, %c0_i32 : i32, i32
  }
}

</mosaic_0001>

<bundles_post_ra>
// kernel: srcnn_forward.2
= control target key start
LH: loop header
LB: loop body
LE: loop exit
PB: predicated region body
PF: predicated region fallthrough
CT: control target
= control target key end

     0   :  { %s1215_s18 = smov 0   ;;  %s1674_s0 = inlined_call_operand.vmem [shape: f32[512,256], index: 0, kind: input, shape index: {}]   ;;  %s1675_s1 = inlined_call_operand.vmem [shape: f32[256,128], index: 1, kind: input, shape index: {}]   ;;  %s1676_s2 = inlined_call_operand.vmem [shape: f32[1,128], index: 2, kind: input, shape index: {}]   ;;  %s1677_s3 = inlined_call_operand.vmem [shape: f32[128,32], index: 3, kind: input, shape index: {}]   ;;  %s1678_s4 = inlined_call_operand.vmem [shape: f32[1,32], index: 4, kind: input, shape index: {}]   ;;  %s1679_s5 = inlined_call_operand.vmem [shape: f32[512,32], index: 5, kind: output, shape index: {}]  }
   0x1 LB: > { %s960_s19 = sadd.s32 4294967295, %s1182_s18   ;;  %p964_p0 = scmp.ge.s32.totalorder %s1182_s18, 1  ;;  %s1182_s18 = sphi %s1215_s18, %s15_s18  }
   0x2   : > { %p189_p1 = scmp.lt.s32.totalorder %s1182_s18, 3 }
   0x4   : > { %p190_p2 = pnand %p964_p0, %p189_p1 }
   0x5   : > { %s965_s22 = sshll.u32 (!%p190_p2), %s960_s19, 5 }
   0x6   : > { %193 = sbr.rel (%p190_p2) target bundleno = 581 (0x245), region = 40  ;;  %p219_p3 = scmp.lt.s32.totalorder (!%p190_p2), %s965_s22, 63 }
   0xb   : > { %v310_v0 = vld [vmem:[%s1675_s1 + $0x78] sm:$0xff]  ;;  %v1184_v1 = vmov 0.0   ;;  %v309_v2 = vld [vmem:[%s1675_s1 + $0x70] sm:$0xff]  ;;  %v308_v3 = vld [vmem:[%s1675_s1 + $0x68] sm:$0xff]  ;;  %s1681_s22 = smov (!%p219_p3, %s965_s22), 63  ;;  %vm871_vm0 = vcmask 261120  }
   0xc   : > { %334 = vmatprep.subr.mxu0 %v1184_v1  ;;  %1103 = vmatprep.subr.mxu1 %v1184_v1  ;;  %v307_v4 = vld [vmem:[%s1675_s1 + $0x60] sm:$0xff]  ;;  %s974_s29 = sshll.u32 %s1681_s22, 4  ;;  %v306_v5 = vld [vmem:[%s1675_s1 + $0x58] sm:$0xff]  ;;  %v305_v6 = vld [vmem:[%s1675_s1 + $0x50] sm:$0xff]  ;;  %s969_s11 = sshll.u32 %s1681_s22, 3 }
   0xd   : > { %335 = vmatpush1.msra.mxu0 %v310_v0  ;;  %1135 = vmatpush1.msra.mxu1 %v310_v0  ;;  %s1251_s9 = scalar_lea.vmem %s1674_s0, %s974_s29  ;;  %v304_v8 = vld [vmem:[%s1675_s1 + $0x48] sm:$0xff]  ;;  %v303_v9 = vld [vmem:[%s1675_s1 + $0x40] sm:$0xff]  ;;  %v302_v10 = vld [vmem:[%s1675_s1 + $0x38] sm:$0xff]  ;;  %s1574_s14 = scalar_lea.vmem %s1679_s5, %s969_s11 }
   0xe   : > { %336 = vmatprep.subr.mxu0 %v1184_v1  ;;  %1104 = vmatprep.subr.mxu1 %v1184_v1  ;;  %v232_v7 = vld [vmem:[%s1251_s9 + $0x8] sm:$0xff]  ;;  %v301_v11 = vld [vmem:[%s1675_s1 + $0x30] sm:$0xff]  ;;  %v299_v13 = vld [vmem:[%s1675_s1 + $0x20] sm:$0xff] }
   0xf   : > { %337 = vmatpush1.msra.mxu0 %v309_v2  ;;  %1136 = vmatpush1.msra.mxu1 %v309_v2  ;;  %v300_v12 = vld [vmem:[%s1675_s1 + $0x28] sm:$0xff]  ;;  %v298_v14 = vld [vmem:[%s1675_s1 + $0x18] sm:$0xff]  ;;  %v297_v15 = vld [vmem:[%s1675_s1 + $0x10] sm:$0xff] }
  0x10   : > { %338 = vmatprep.subr.mxu0 %v1184_v1  ;;  %1105 = vmatprep.subr.mxu1 %v1184_v1  ;;  %v296_v16 = vld [vmem:[%s1675_s1 + $0x8] sm:$0xff]  ;;  %v295_v17 = vld [vmem:[%s1675_s1] sm:$0xff]  ;;  %v326_v18 = vld [vmem:[%s1675_s1 + $0xf8] sm:$0xff] }
  0x11   : > { %339 = vmatpush1.msra.mxu0 %v308_v3  ;;  %1137 = vmatpush1.msra.mxu1 %v308_v3  ;;  %v325_v19 = vld [vmem:[%s1675_s1 + $0xf0] sm:$0xff]  ;;  %v324_v20 = vld [vmem:[%s1675_s1 + $0xe8] sm:$0xff]  ;;  %v323_v21 = vld [vmem:[%s1675_s1 + $0xe0] sm:$0xff] }
  0x12   : > { %340 = vmatprep.subr.mxu0 %v1184_v1  ;;  %1106 = vmatprep.subr.mxu1 %v1184_v1  ;;  %v322_v22 = vld [vmem:[%s1675_s1 + $0xd8] sm:$0xff]  ;;  %v321_v23 = vld [vmem:[%s1675_s1 + $0xd0] sm:$0xff]  ;;  %v320_v24 = vld [vmem:[%s1675_s1 + $0xc8] sm:$0xff] }
  0x13   : > { %341 = vmatpush1.msra.mxu0 %v307_v4  ;;  %1138 = vmatpush1.msra.mxu1 %v307_v4  ;;  %v319_v25 = vld [vmem:[%s1675_s1 + $0xc0] sm:$0xff]  ;;  %v318_v26 = vld [vmem:[%s1675_s1 + $0xb8] sm:$0xff]  ;;  %v317_v27 = vld [vmem:[%s1675_s1 + $0xb0] sm:$0xff] }
  0x14   : > { %342 = vmatprep.subr.mxu0 %v1184_v1  ;;  %1107 = vmatprep.subr.mxu1 %v1184_v1  ;;  %v316_v28 = vld [vmem:[%s1675_s1 + $0xa8] sm:$0xff]  ;;  %v315_v29 = vld [vmem:[%s1675_s1 + $0xa0] sm:$0xff]  ;;  %v314_v30 = vld [vmem:[%s1675_s1 + $0x98] sm:$0xff] }
  0x15   : > { %343 = vmatpush1.msra.mxu0 %v306_v5  ;;  %1139 = vmatpush1.msra.mxu1 %v306_v5  ;;  %v313_v31 = vld [vmem:[%s1675_s1 + $0x90] sm:$0xff]  ;;  %v312_v32 = vld [vmem:[%s1675_s1 + $0x88] sm:$0xff]  ;;  %v311_v33 = vld [vmem:[%s1675_s1 + $0x80] sm:$0xff] }
  0x16   : > { %344 = vmatprep.subr.mxu0 %v1184_v1  ;;  %398 = vmatprep.mubr.f32.mxu0 %v232_v7  ;;  %v231_v34 = vld [vmem:[%s1251_s9] sm:$0xff]  ;;  %v234_v35 = vld [vmem:[%s1251_s9 + $0x18] sm:$0xff]  ;;  %v280_v36 = vld [vmem:[%s1251_s9 + $0x188] sm:$0xff] }
  0x17   : > { %345 = vmatpush1.msra.mxu0 %v305_v6  ;;  %1108 = vmatprep.subr.mxu1 %v1184_v1  ;;  %v279_v37 = vld [vmem:[%s1251_s9 + $0x180] sm:$0xff]  ;;  %v606_v38 = vld [vmem:[%s1677_s3 + $0x78] sm:$0xff]  ;;  %v233_v40 = vld [vmem:[%s1251_s9 + $0x10] sm:$0xff] }
  0x18   : > { %346 = vmatprep.subr.mxu0 %v1184_v1  ;;  %1140 = vmatpush1.msra.mxu1 %v305_v6  ;;  %v282_v39 = vld [vmem:[%s1251_s9 + $0x198] sm:$0xff]  ;;  %v605_v41 = vld [vmem:[%s1677_s3 + $0x70] sm:$0xff]  ;;  %v236_v42 = vld [vmem:[%s1251_s9 + $0x28] sm:$0xff] }
  0x19   : > { %347 = vmatpush1.msra.mxu0 %v304_v8  ;;  %1109 = vmatprep.subr.mxu1 %v1184_v1  ;;  %v281_v43 = vld [vmem:[%s1251_s9 + $0x190] sm:$0xff]  ;;  %v604_v44 = vld [vmem:[%s1677_s3 + $0x68] sm:$0xff]  ;;  %v235_v46 = vld [vmem:[%s1251_s9 + $0x20] sm:$0xff] }
  0x1a   : > { %348 = vmatprep.subr.mxu0 %v1184_v1  ;;  %1141 = vmatpush1.msra.mxu1 %v304_v8  ;;  %v284_v45 = vld [vmem:[%s1251_s9 + $0x1a8] sm:$0xff]  ;;  %v603_v47 = vld [vmem:[%s1677_s3 + $0x60] sm:$0xff]  ;;  %v238_v48 = vld [vmem:[%s1251_s9 + $0x38] sm:$0xff] }
  0x1b   : > { %349 = vmatpush1.msra.mxu0 %v303_v9  ;;  %1110 = vmatprep.subr.mxu1 %v1184_v1  ;;  %v283_v49 = vld [vmem:[%s1251_s9 + $0x1a0] sm:$0xff]  ;;  %v602_v50 = vld [vmem:[%s1677_s3 + $0x58] sm:$0xff]  ;;  %v237_v52 = vld [vmem:[%s1251_s9 + $0x30] sm:$0xff] }
  0x1c   : > { %350 = vmatprep.subr.mxu0 %v1184_v1  ;;  %1142 = vmatpush1.msra.mxu1 %v303_v9  ;;  %v286_v51 = vld [vmem:[%s1251_s9 + $0x1b8] sm:$0xff]  ;;  %v601_v53 = vld [vmem:[%s1677_s3 + $0x50] sm:$0xff]  ;;  %v240_v54 = vld [vmem:[%s1251_s9 + $0x48] sm:$0xff] }
  0x1d   : > { %351 = vmatpush1.msra.mxu0 %v302_v10  ;;  %1111 = vmatprep.subr.mxu1 %v1184_v1  ;;  %v285_v55 = vld [vmem:[%s1251_s9 + $0x1b0] sm:$0xff]  ;;  %v600_v56 = vld [vmem:[%s1677_s3 + $0x48] sm:$0xff]  ;;  %v239_v58 = vld [vmem:[%s1251_s9 + $0x40] sm:$0xff] }
  0x1e   : > { %352 = vmatprep.subr.mxu0 %v1184_v1  ;;  %1143 = vmatpush1.msra.mxu1 %v302_v10  ;;  %v288_v57 = vld [vmem:[%s1251_s9 + $0x1c8] sm:$0xff]  ;;  %v599_v59 = vld [vmem:[%s1677_s3 + $0x40] sm:$0xff]  ;;  %v242_v60 = vld [vmem:[%s1251_s9 + $0x58] sm:$0xff] }
  0x1f   : > { %353 = vmatpush1.msra.mxu0 %v301_v11  ;;  %1112 = vmatprep.subr.mxu1 %v1184_v1  ;;  %v287_v61 = vld [vmem:[%s1251_s9 + $0x1c0] sm:$0xff]  ;;  %v598_v62 = vld [vmem:[%s1677_s3 + $0x38] sm:$0xff]  ;;  %v241_v0 = vld [vmem:[%s1251_s9 + $0x50] sm:$0xff] }
  0x20   : > { %354 = vmatprep.subr.mxu0 %v1184_v1  ;;  %1144 = vmatpush1.msra.mxu1 %v301_v11  ;;  %v290_v63 = vld [vmem:[%s1251_s9 + $0x1d8] sm:$0xff]  ;;  %v244_v2 = vld [vmem:[%s1251_s9 + $0x68] sm:$0xff]  ;;  %v289_v3 = vld [vmem:[%s1251_s9 + $0x1d0] sm:$0xff] }
  0x21   : > { %355 = vmatpush1.msra.mxu0 %v300_v12  ;;  %1113 = vmatprep.subr.mxu1 %v1184_v1  ;;  %v596_v4 = vld [vmem:[%s1677_s3 + $0x28] sm:$0xff]  ;;  %v243_v6 = vld [vmem:[%s1251_s9 + $0x60] sm:$0xff]  ;;  %v246_v8 = vld [vmem:[%s1251_s9 + $0x78] sm:$0xff] }
  0x22   : > { %356 = vmatprep.subr.mxu0 %v1184_v1  ;;  %1145 = vmatpush1.msra.mxu1 %v300_v12  ;;  %v292_v5 = vld [vmem:[%s1251_s9 + $0x1e8] sm:$0xff]  ;;  %v595_v7 = vld [vmem:[%s1677_s3 + $0x20] sm:$0xff]  ;;  %v294_v10 = vld [vmem:[%s1251_s9 + $0x1f8] sm:$0xff] }
  0x23   : > { %357 = vmatpush1.msra.mxu0 %v299_v13  ;;  %1114 = vmatprep.subr.mxu1 %v1184_v1  ;;  %v291_v9 = vld [vmem:[%s1251_s9 + $0x1e0] sm:$0xff]  ;;  %v245_v11 = vld [vmem:[%s1251_s9 + $0x70] sm:$0xff]  ;;  %v248_v12 = vld [vmem:[%s1251_s9 + $0x88] sm:$0xff] }
  0x24   : > { %358 = vmatprep.subr.mxu0 %v1184_v1  ;;  %1146 = vmatpush1.msra.mxu1 %v299_v13  ;;  %v293_v13 = vld [vmem:[%s1251_s9 + $0x1f0] sm:$0xff] }
  0x25   : > { %359 = vmatpush1.msra.mxu0 %v298_v14  ;;  %1115 = vmatprep.subr.mxu1 %v1184_v1 }
  0x26   : > { %360 = vmatprep.subr.mxu0 %v1184_v1  ;;  %1147 = vmatpush1.msra.mxu1 %v298_v14  ;;  %v247_v14 = vld [vmem:[%s1251_s9 + $0x80] sm:$0xff] }
  0x27   : > { %361 = vmatpush1.msra.mxu0 %v297_v15  ;;  %1116 = vmatprep.subr.mxu1 %v1184_v1 }
  0x28   : > { %362 = vmatprep.subr.mxu0 %v1184_v1  ;;  %1148 = vmatpush1.msra.mxu1 %v297_v15  ;;  %v250_v15 = vld [vmem:[%s1251_s9 + $0x98] sm:$0xff] }
  0x29   : > { %363 = vmatpush1.msra.mxu0 %v296_v16  ;;  %1117 = vmatprep.subr.mxu1 %v1184_v1 }
  0x2a   : > { %364 = vmatprep.subr.mxu0 %v1184_v1  ;;  %1149 = vmatpush1.msra.mxu1 %v296_v16  ;;  %v249_v16 = vld [vmem:[%s1251_s9 + $0x90] sm:$0xff] }
  0x2b   : > { %365 = vmatpush1.msra.mxu0 %v295_v17  ;;  %1118 = vmatprep.subr.mxu1 %v1184_v1 }
  0x2c   : > { %366 = vmatprep.subr.mxu0 %v1184_v1  ;;  %1150 = vmatpush1.msra.mxu1 %v295_v17  ;;  %v252_v17 = vld [vmem:[%s1251_s9 + $0xa8] sm:$0xff] }
  0x2d   : > { %367 = vmatpush2.msra.mxu0 %v326_v18  ;;  %1119 = vmatprep.subr.mxu1 %v1184_v1 }
  0x2e   : > { %368 = vmatprep.subr.mxu0 %v1184_v1  ;;  %1151 = vmatpush2.msra.mxu1 %v326_v18  ;;  %v251_v18 = vld [vmem:[%s1251_s9 + $0xa0] sm:$0xff] }
  0x2f   : > { %369 = vmatpush2.msra.mxu0 %v325_v19  ;;  %1120 = vmatprep.subr.mxu1 %v1184_v1 }
  0x30   : > { %370 = vmatprep.subr.mxu0 %v1184_v1  ;;  %1152 = vmatpush2.msra.mxu1 %v325_v19  ;;  %v254_v19 = vld [vmem:[%s1251_s9 + $0xb8] sm:$0xff] }
  0x31   : > { %371 = vmatpush2.msra.mxu0 %v324_v20  ;;  %1121 = vmatprep.subr.mxu1 %v1184_v1 }
  0x32   : > { %372 = vmatprep.subr.mxu0 %v1184_v1  ;;  %1153 = vmatpush2.msra.mxu1 %v324_v20  ;;  %v253_v20 = vld [vmem:[%s1251_s9 + $0xb0] sm:$0xff] }
  0x33   : > { %373 = vmatpush2.msra.mxu0 %v323_v21  ;;  %1122 = vmatprep.subr.mxu1 %v1184_v1 }
  0x34   : > { %374 = vmatprep.subr.mxu0 %v1184_v1  ;;  %1154 = vmatpush2.msra.mxu1 %v323_v21  ;;  %v256_v21 = vld [vmem:[%s1251_s9 + $0xc8] sm:$0xff] }
  0x35   : > { %375 = vmatpush2.msra.mxu0 %v322_v22  ;;  %1123 = vmatprep.subr.mxu1 %v1184_v1 }
  0x36   : > { %376 = vmatprep.subr.mxu0 %v1184_v1  ;;  %1155 = vmatpush2.msra.mxu1 %v322_v22  ;;  %v255_v22 = vld [vmem:[%s1251_s9 + $0xc0] sm:$0xff] }
  0x37   : > { %377 = vmatpush2.msra.mxu0 %v321_v23  ;;  %1124 = vmatprep.subr.mxu1 %v1184_v1 }
  0x38   : > { %378 = vmatprep.subr.mxu0 %v1184_v1  ;;  %1156 = vmatpush2.msra.mxu1 %v321_v23  ;;  %v258_v23 = vld [vmem:[%s1251_s9 + $0xd8] sm:$0xff] }
  0x39   : > { %379 = vmatpush2.msra.mxu0 %v320_v24  ;;  %1125 = vmatprep.subr.mxu1 %v1184_v1 }
  0x3a   : > { %380 = vmatprep.subr.mxu0 %v1184_v1  ;;  %1157 = vmatpush2.msra.mxu1 %v320_v24  ;;  %v257_v24 = vld [vmem:[%s1251_s9 + $0xd0] sm:$0xff] }
  0x3b   : > { %381 = vmatpush2.msra.mxu0 %v319_v25  ;;  %1126 = vmatprep.subr.mxu1 %v1184_v1 }
  0x3c   : > { %382 = vmatprep.subr.mxu0 %v1184_v1  ;;  %1158 = vmatpush2.msra.mxu1 %v319_v25  ;;  %v260_v25 = vld [vmem:[%s1251_s9 + $0xe8] sm:$0xff] }
  0x3d   : > { %383 = vmatpush2.msra.mxu0 %v318_v26  ;;  %1127 = vmatprep.subr.mxu1 %v1184_v1 }
  0x3e   : > { %384 = vmatprep.subr.mxu0 %v1184_v1  ;;  %1159 = vmatpush2.msra.mxu1 %v318_v26  ;;  %v259_v26 = vld [vmem:[%s1251_s9 + $0xe0] sm:$0xff] }
  0x3f   : > { %385 = vmatpush2.msra.mxu0 %v317_v27  ;;  %1128 = vmatprep.subr.mxu1 %v1184_v1 }
  0x40   : > { %386 = vmatprep.subr.mxu0 %v1184_v1  ;;  %1160 = vmatpush2.msra.mxu1 %v317_v27  ;;  %v262_v27 = vld [vmem:[%s1251_s9 + $0xf8] sm:$0xff] }
  0x41   : > { %387 = vmatpush2.msra.mxu0 %v316_v28  ;;  %1129 = vmatprep.subr.mxu1 %v1184_v1 }
  0x42   : > { %388 = vmatprep.subr.mxu0 %v1184_v1  ;;  %1161 = vmatpush2.msra.mxu1 %v316_v28  ;;  %v261_v28 = vld [vmem:[%s1251_s9 + $0xf0] sm:$0xff] }
  0x43   : > { %389 = vmatpush2.msra.mxu0 %v315_v29  ;;  %1130 = vmatprep.subr.mxu1 %v1184_v1 }
  0x44   : > { %390 = vmatprep.subr.mxu0 %v1184_v1  ;;  %1162 = vmatpush2.msra.mxu1 %v315_v29  ;;  %v264_v29 = vld [vmem:[%s1251_s9 + $0x108] sm:$0xff] }
  0x45   : > { %391 = vmatpush2.msra.mxu0 %v314_v30  ;;  %1131 = vmatprep.subr.mxu1 %v1184_v1 }
  0x46   : > { %392 = vmatprep.subr.mxu0 %v1184_v1  ;;  %1163 = vmatpush2.msra.mxu1 %v314_v30  ;;  %v263_v30 = vld [vmem:[%s1251_s9 + $0x100] sm:$0xff] }
  0x47   : > { %393 = vmatpush2.msra.mxu0 %v313_v31  ;;  %1132 = vmatprep.subr.mxu1 %v1184_v1 }
  0x48   : > { %394 = vmatprep.subr.mxu0 %v1184_v1  ;;  %1164 = vmatpush2.msra.mxu1 %v313_v31  ;;  %v266_v31 = vld [vmem:[%s1251_s9 + $0x118] sm:$0xff] }
  0x49   : > { %395 = vmatpush2.msra.mxu0 %v312_v32  ;;  %1133 = vmatprep.subr.mxu1 %v1184_v1 }
  0x4a   : > { %396 = vmatprep.subr.mxu0 %v1184_v1  ;;  %1165 = vmatpush2.msra.mxu1 %v312_v32  ;;  %v594_v32 = vld [vmem:[%s1677_s3 + $0x18] sm:$0xff] }
  0x4b   : > { %397 = vmatpush2.msra.mxu0 %v311_v33  ;;  %1134 = vmatprep.subr.mxu1 %v1184_v1  ;;  %v597_v1 = vld [vmem:[%s1677_s3 + $0x30] sm:$0xff] }
  0x4c   : > { %399 = vmatmul.mubr.f32.vlgmr.msra.gmra.mxu0 %v231_v34  ;;  %1166 = vmatpush2.msra.mxu1 %v311_v33  ;;  %v265_v33 = vld [vmem:[%s1251_s9 + $0x110] sm:$0xff]  ;;  %v268_v34 = vld [vmem:[%s1251_s9 + $0x128] sm:$0xff] }
  0x4d   : > { %403 = vmatprep.mubr.f32.mxu0 %v234_v35  ;;  %518 = vmatprep.mubr.f32.mxu1 %v280_v36  ;;  %v593_v35 = vld [vmem:[%s1677_s3 + $0x10] sm:$0xff]  ;;  %v592_v36 = vld [vmem:[%s1677_s3 + $0x8] sm:$0xff] }
  0x4e   : > { %519 = vmatmul.mubr.f32.vlgmr.msra.gmra.mxu1 %v279_v37  ;;  %1023 = vmatprep.subr.mxu1 %v606_v38  ;;  %v267_v37 = vld [vmem:[%s1251_s9 + $0x120] sm:$0xff] }
  0x4f   : > { %523 = vmatprep.mubr.f32.mxu1 %v282_v39  ;;  %1024 = vmatpush3.msra.mxu1 %v606_v38  ;;  %v270_v38 = vld [vmem:[%s1251_s9 + $0x138] sm:$0xff]  ;;  %v591_v39 = vld [vmem:[%s1677_s3] sm:$0xff] }
  0x50   : > { %404 = vmatmul.mubr.f32.gmra.mxu0 %v233_v40  ;;  %1025 = vmatprep.subr.mxu1 %v605_v41  ;;  %v269_v40 = vld [vmem:[%s1251_s9 + $0x130] sm:$0xff] }
  0x51   : > { %408 = vmatprep.mubr.f32.mxu0 %v236_v42  ;;  %1026 = vmatpush3.msra.mxu1 %v605_v41  ;;  %v272_v41 = vld [vmem:[%s1251_s9 + $0x148] sm:$0xff]  ;;  %v271_v42 = vld [vmem:[%s1251_s9 + $0x140] sm:$0xff] }
  0x52   : > { %524 = vmatmul.mubr.f32.gmra.mxu1 %v281_v43  ;;  %1027 = vmatprep.subr.mxu1 %v604_v44  ;;  %v274_v43 = vld [vmem:[%s1251_s9 + $0x158] sm:$0xff] }
  0x53   : > { %528 = vmatprep.mubr.f32.mxu1 %v284_v45  ;;  %1028 = vmatpush3.msra.mxu1 %v604_v44  ;;  %v273_v44 = vld [vmem:[%s1251_s9 + $0x150] sm:$0xff]  ;;  %v276_v45 = vld [vmem:[%s1251_s9 + $0x168] sm:$0xff] }
  0x54   : > { %409 = vmatmul.mubr.f32.gmra.mxu0 %v235_v46  ;;  %1029 = vmatprep.subr.mxu1 %v603_v47  ;;  %v275_v46 = vld [vmem:[%s1251_s9 + $0x160] sm:$0xff] }
  0x55   : > { %413 = vmatprep.mubr.f32.mxu0 %v238_v48  ;;  %1030 = vmatpush3.msra.mxu1 %v603_v47  ;;  %v278_v47 = vld [vmem:[%s1251_s9 + $0x178] sm:$0xff]  ;;  %v277_v48 = vld [vmem:[%s1251_s9 + $0x170] sm:$0xff] }
  0x56   : > { %529 = vmatmul.mubr.f32.gmra.mxu1 %v283_v49  ;;  %1031 = vmatprep.subr.mxu1 %v602_v50  ;;  %v1506_v49 = vld [vmem:[%s1676_s2] ss:$0 sm:$0xff] }
  0x57   : > { %533 = vmatprep.mubr.f32.mxu1 %v286_v51  ;;  %1032 = vmatpush3.msra.mxu1 %v602_v50 }
  0x58   : > { %414 = vmatmul.mubr.f32.gmra.mxu0 %v237_v52  ;;  %1033 = vmatprep.subr.mxu1 %v601_v53 }
  0x59   : > { %418 = vmatprep.mubr.f32.mxu0 %v240_v54  ;;  %1034 = vmatpush3.msra.mxu1 %v601_v53 }
  0x5a   : > { %534 = vmatmul.mubr.f32.gmra.mxu1 %v285_v55  ;;  %1035 = vmatprep.subr.mxu1 %v600_v56 }
  0x5b   : > { %538 = vmatprep.mubr.f32.mxu1 %v288_v57  ;;  %1036 = vmatpush3.msra.mxu1 %v600_v56 }
  0x5c   : > { %419 = vmatmul.mubr.f32.gmra.mxu0 %v239_v58  ;;  %1037 = vmatprep.subr.mxu1 %v599_v59 }
  0x5d   : > { %423 = vmatprep.mubr.f32.mxu0 %v242_v60  ;;  %1038 = vmatpush3.msra.mxu1 %v599_v59 }
  0x5e   : > { %539 = vmatmul.mubr.f32.gmra.mxu1 %v287_v61  ;;  %1039 = vmatprep.subr.mxu1 %v598_v62 }
  0x5f   : > { %543 = vmatprep.mubr.f32.mxu1 %v290_v63  ;;  %1040 = vmatpush3.msra.mxu1 %v598_v62 }
  0x60   : > { %424 = vmatmul.mubr.f32.gmra.mxu0 %v241_v0  ;;  %1041 = vmatprep.subr.mxu1 %v597_v1 }
  0x61   : > { %428 = vmatprep.mubr.f32.mxu0 %v244_v2  ;;  %1042 = vmatpush3.msra.mxu1 %v597_v1 }
  0x62   : > { %544 = vmatmul.mubr.f32.gmra.mxu1 %v289_v3  ;;  %1043 = vmatprep.subr.mxu1 %v596_v4 }
  0x63   : > { %548 = vmatprep.mubr.f32.mxu1 %v292_v5  ;;  %1044 = vmatpush3.msra.mxu1 %v596_v4 }
  0x64   : > { %429 = vmatmul.mubr.f32.gmra.mxu0 %v243_v6  ;;  %1045 = vmatprep.subr.mxu1 %v595_v7 }
  0x65   : > { %433 = vmatprep.mubr.f32.mxu0 %v246_v8  ;;  %1046 = vmatpush3.msra.mxu1 %v595_v7 }
  0x66   : > { %549 = vmatmul.mubr.f32.gmra.mxu1 %v291_v9  ;;  %1047 = vmatprep.subr.mxu1 %v594_v32 }
  0x67   : > { %553 = vmatprep.mubr.f32.mxu1 %v294_v10  ;;  %1048 = vmatpush3.msra.mxu1 %v594_v32 }
  0x68   : > { %434 = vmatmul.mubr.f32.gmra.mxu0 %v245_v11  ;;  %1049 = vmatprep.subr.mxu1 %v593_v35 }
  0x69   : > { %438 = vmatprep.mubr.f32.mxu0 %v248_v12  ;;  %1050 = vmatpush3.msra.mxu1 %v593_v35 }
  0x6a   : > { %554 = vmatmul.mubr.f32.gmra.mxu1 %v293_v13  ;;  %1051 = vmatprep.subr.mxu1 %v592_v36 }
  0x6b   : > { %1052 = vmatpush3.msra.mxu1 %v592_v36 }
  0x6c   : > { %439 = vmatmul.mubr.f32.gmra.mxu0 %v247_v14  ;;  %1053 = vmatprep.subr.mxu1 %v591_v39 }
  0x6d   : > { %443 = vmatprep.mubr.f32.mxu0 %v250_v15  ;;  %1054 = vmatpush3.msra.mxu1 %v591_v39 }
  0x70   : > { %444 = vmatmul.mubr.f32.gmra.mxu0 %v249_v16 }
  0x71   : > { %448 = vmatprep.mubr.f32.mxu0 %v252_v17 }
  0x74   : > { %449 = vmatmul.mubr.f32.gmra.mxu0 %v251_v18 }
  0x75   : > { %453 = vmatprep.mubr.f32.mxu0 %v254_v19 }
  0x78   : > { %454 = vmatmul.mubr.f32.gmra.mxu0 %v253_v20 }
  0x79   : > { %458 = vmatprep.mubr.f32.mxu0 %v256_v21 }
  0x7c   : > { %459 = vmatmul.mubr.f32.gmra.mxu0 %v255_v22 }
  0x7d   : > { %463 = vmatprep.mubr.f32.mxu0 %v258_v23 }
  0x80   : > { %464 = vmatmul.mubr.f32.gmra.mxu0 %v257_v24 }
  0x81   : > { %468 = vmatprep.mubr.f32.mxu0 %v260_v25 }
  0x84   : > { %469 = vmatmul.mubr.f32.gmra.mxu0 %v259_v26 }
  0x85   : > { %473 = vmatprep.mubr.f32.mxu0 %v262_v27 }
  0x88   : > { %474 = vmatmul.mubr.f32.gmra.mxu0 %v261_v28 }
  0x89   : > { %478 = vmatprep.mubr.f32.mxu0 %v264_v29 }
  0x8c   : > { %479 = vmatmul.mubr.f32.gmra.mxu0 %v263_v30 }
  0x8d   : > { %483 = vmatprep.mubr.f32.mxu0 %v266_v31 }
  0x90   : > { %484 = vmatmul.mubr.f32.gmra.mxu0 %v265_v33 }
  0x91   : > { %488 = vmatprep.mubr.f32.mxu0 %v268_v34 }
  0x94   : > { %489 = vmatmul.mubr.f32.gmra.mxu0 %v267_v37 }
  0x95   : > { %493 = vmatprep.mubr.f32.mxu0 %v270_v38 }
  0x98   : > { %494 = vmatmul.mubr.f32.gmra.mxu0 %v269_v40 }
  0x99   : > { %498 = vmatprep.mubr.f32.mxu0 %v272_v41 }
  0x9c   : > { %499 = vmatmul.mubr.f32.gmra.mxu0 %v271_v42 }
  0x9d   : > { %503 = vmatprep.mubr.f32.mxu0 %v274_v43 }
  0xa0   : > { %504 = vmatmul.mubr.f32.gmra.mxu0 %v273_v44 }
  0xa1   : > { %508 = vmatprep.mubr.f32.mxu0 %v276_v45 }
  0xa4   : > { %509 = vmatmul.mubr.f32.gmra.mxu0 %v275_v46 }
  0xa5   : > { %513 = vmatprep.mubr.f32.mxu0 %v278_v47 }
  0xa8   : > { %514 = vmatmul.mubr.f32.gmra.mxu0 %v277_v48 }
 0x10c   : > { %v400_v50 = vpop.f32.mrf.mxu0 }
 0x10d   : > { %v401_v51 = vadd.f32 %v1506_v49, %v400_v50 }
 0x10e   : > { %v402_v52 = vpop.f32.mrf.mxu0  ;;  %v1509_v53 = vpop.f32.mrf.mxu1 }
 0x10f   : > { %v559_v54 = vmax.f32 %v401_v51, 0.0 }
 0x110   : > { %v405_v55 = vpop.f32.mrf.mxu0  ;;  %v522_v56 = vpop.f32.mrf.mxu1 }
 0x111   : > { %v406_v57 = vadd.f32 %v1506_v49, %v405_v55  ;;  %1055 = vmatprep.mubr.f32.mxu1 %v559_v54 }
 0x112   : > { %v407_v58 = vpop.f32.mrf.mxu0  ;;  %v1512_v59 = vpop.f32.mrf.mxu1 }
 0x113   : > { %v560_v60 = vmax.f32 %v406_v57, 0.0 }
 0x114   : > { %v410_v61 = vpop.f32.mrf.mxu0  ;;  %v527_v62 = vpop.f32.mrf.mxu1 }
 0x115   : > { %v411_v63 = vadd.f32 %v1506_v49, %v410_v61  ;;  %1056 = vmatmul.mubr.f32.vlgmr.msra.gmra.mxu1 %v560_v60 }
 0x116   : > { %v412_v0 = vpop.f32.mrf.mxu0  ;;  %v1515_v1 = vpop.f32.mrf.mxu1 }
 0x117   : > { %v561_v2 = vmax.f32 %v411_v63, 0.0 }
 0x118   : > { %v415_v3 = vpop.f32.mrf.mxu0  ;;  %v532_v4 = vpop.f32.mrf.mxu1 }
 0x119   : > { %v416_v5 = vadd.f32 %v1506_v49, %v415_v3  ;;  %1058 = vmatprep.mubr.f32.mxu1 %v561_v2 }
 0x11a   : > { %v417_v6 = vpop.f32.mrf.mxu0  ;;  %v1518_v7 = vpop.f32.mrf.mxu1 }
 0x11b   : > { %v562_v8 = vmax.f32 %v416_v5, 0.0 }
 0x11c   : > { %v420_v9 = vpop.f32.mrf.mxu0  ;;  %v537_v10 = vpop.f32.mrf.mxu1 }
 0x11d   : > { %v421_v11 = vadd.f32 %v1506_v49, %v420_v9  ;;  %1059 = vmatmul.mubr.f32.gmra.mxu1 %v562_v8 }
 0x11e   : > { %v422_v12 = vpop.f32.mrf.mxu0  ;;  %v1521_v13 = vpop.f32.mrf.mxu1 }
 0x11f   : > { %v563_v14 = vmax.f32 %v421_v11, 0.0 }
 0x120   : > { %v425_v15 = vpop.f32.mrf.mxu0  ;;  %v542_v16 = vpop.f32.mrf.mxu1 }
 0x121   : > { %v426_v17 = vadd.f32 %v1506_v49, %v425_v15  ;;  %1061 = vmatprep.mubr.f32.mxu1 %v563_v14 }
 0x122   : > { %v427_v18 = vpop.f32.mrf.mxu0  ;;  %v1524_v19 = vpop.f32.mrf.mxu1 }
 0x123   : > { %v564_v20 = vmax.f32 %v426_v17, 0.0 }
 0x124   : > { %v430_v21 = vpop.f32.mrf.mxu0  ;;  %v547_v22 = vpop.f32.mrf.mxu1 }
 0x125   : > { %v431_v23 = vadd.f32 %v1506_v49, %v430_v21  ;;  %1062 = vmatmul.mubr.f32.gmra.mxu1 %v564_v20 }
 0x126   : > { %v432_v24 = vpop.f32.mrf.mxu0  ;;  %v1527_v25 = vpop.f32.mrf.mxu1 }
 0x127   : > { %v565_v26 = vmax.f32 %v431_v23, 0.0 }
 0x128   : > { %v435_v27 = vpop.f32.mrf.mxu0  ;;  %v552_v28 = vpop.f32.mrf.mxu1 }
 0x129   : > { %v436_v29 = vadd.f32 %v1506_v49, %v435_v27  ;;  %1064 = vmatprep.mubr.f32.mxu1 %v565_v26 }
 0x12a   : > { %v437_v30 = vpop.f32.mrf.mxu0  ;;  %v1530_v31 = vpop.f32.mrf.mxu1 }
 0x12b   : > { %v566_v32 = vmax.f32 %v436_v29, 0.0 }
 0x12c   : > { %v440_v33 = vpop.f32.mrf.mxu0  ;;  %v557_v34 = vpop.f32.mrf.mxu1 }
 0x12d   : > { %v441_v35 = vadd.f32 %v1506_v49, %v440_v33  ;;  %1065 = vmatmul.mubr.f32.gmra.mxu1 %v566_v32 }
 0x12e   : > { %v442_v36 = vpop.f32.mrf.mxu0 }
 0x12f   : > { %v567_v37 = vmax.f32 %v441_v35, 0.0 }
 0x130   : > { %v445_v38 = vpop.f32.mrf.mxu0 }
 0x131   : > { %v446_v39 = vadd.f32 %v1506_v49, %v445_v38  ;;  %1067 = vmatprep.mubr.f32.mxu1 %v567_v37 }
 0x132   : > { %v447_v40 = vpop.f32.mrf.mxu0 }
 0x133   : > { %v568_v41 = vmax.f32 %v446_v39, 0.0  ;;  %v521_v39 = vadd.f32 %v1506_v49, %v1509_v53 }
 0x134   : > { %v450_v42 = vpop.f32.mrf.mxu0 }
 0x135   : > { %v451_v43 = vadd.f32 %v1506_v49, %v450_v42  ;;  %1068 = vmatmul.mubr.f32.gmra.mxu1 %v568_v41 }
 0x136   : > { %v452_v44 = vpop.f32.mrf.mxu0 }
 0x137   : > { %v569_v45 = vmax.f32 %v451_v43, 0.0  ;;  %v526_v43 = vadd.f32 %v1506_v49, %v1512_v59  ;;  %v551_v59 = vadd.f32 %v1506_v49, %v1527_v25 }
 0x138   : > { %v455_v46 = vpop.f32.mrf.mxu0 }
 0x139   : > { %v456_v47 = vadd.f32 %v1506_v49, %v455_v46  ;;  %1070 = vmatprep.mubr.f32.mxu1 %v569_v45  ;;  %v583_v45 = vmax.f32 %v521_v39, 0.0  ;;  %v531_v46 = vadd.f32 %v1506_v49, %v1515_v1  ;;  %v546_v1 = vadd.f32 %v1506_v49, %v1524_v19 }
 0x13a   : > { %v457_v48 = vpop.f32.mrf.mxu0 }
 0x13b   : > { %v570_v50 = vmax.f32 %v456_v47, 0.0  ;;  %v584_v47 = vmax.f32 %v526_v43, 0.0  ;;  %v536_v48 = vadd.f32 %v1506_v49, %v1518_v7  ;;  %v585_v53 = vmax.f32 %v531_v46, 0.0 }
 0x13c   : > { %v460_v51 = vpop.f32.mrf.mxu0  ;;  %v589_v7 = vmax.f32 %v551_v59, 0.0 }
 0x13d   : > { %v461_v52 = vadd.f32 %v1506_v49, %v460_v51  ;;  %1071 = vmatmul.mubr.f32.gmra.mxu1 %v570_v50  ;;  %v541_v50 = vadd.f32 %v1506_v49, %v1521_v13  ;;  %v586_v51 = vmax.f32 %v536_v48, 0.0  ;;  %v1567_v13 = vld [vmem:[%s1678_s4] ss:$0 sm:$0xff] }
 0x13e   : > { %v462_v54 = vpop.f32.mrf.mxu0 }
 0x13f   : > { %v571_v55 = vmax.f32 %v461_v52, 0.0  ;;  %v587_v52 = vmax.f32 %v541_v50, 0.0  ;;  %v556_v54 = vadd.f32 %v1506_v49, %v1530_v31 }
 0x140   : > { %v465_v56 = vpop.f32.mrf.mxu0 }
 0x141   : > { %v466_v57 = vadd.f32 %v1506_v49, %v465_v56  ;;  %1073 = vmatprep.mubr.f32.mxu1 %v571_v55  ;;  %v588_v55 = vmax.f32 %v546_v1, 0.0  ;;  %v590_v56 = vmax.f32 %v556_v54, 0.0 }
 0x142   : > { %v467_v58 = vpop.f32.mrf.mxu0 }
 0x143   : > { %v572_v60 = vmax.f32 %v466_v57, 0.0 }
 0x144   : > { %v470_v61 = vpop.f32.mrf.mxu0 }
 0x145   : > { %v471_v62 = vadd.f32 %v1506_v49, %v470_v61  ;;  %1074 = vmatmul.mubr.f32.gmra.mxu1 %v572_v60 }
 0x146   : > { %v472_v63 = vpop.f32.mrf.mxu0 }
 0x147   : > { %v573_v0 = vmax.f32 %v471_v62, 0.0 }
 0x148   : > { %v475_v2 = vpop.f32.mrf.mxu0 }
 0x149   : > { %v476_v3 = vadd.f32 %v1506_v49, %v475_v2  ;;  %1076 = vmatprep.mubr.f32.mxu1 %v573_v0 }
 0x14a   : > { %v477_v4 = vpop.f32.mrf.mxu0 }
 0x14b   : > { %v574_v5 = vmax.f32 %v476_v3, 0.0 }
 0x14c   : > { %v480_v6 = vpop.f32.mrf.mxu0 }
 0x14d   : > { %v481_v8 = vadd.f32 %v1506_v49, %v480_v6  ;;  %1077 = vmatmul.mubr.f32.gmra.mxu1 %v574_v5 }
 0x14e   : > { %v482_v9 = vpop.f32.mrf.mxu0 }
 0x14f   : > { %v575_v10 = vmax.f32 %v481_v8, 0.0 }
 0x150   : > { %v485_v11 = vpop.f32.mrf.mxu0 }
 0x151   : > { %v486_v12 = vadd.f32 %v1506_v49, %v485_v11  ;;  %1079 = vmatprep.mubr.f32.mxu1 %v575_v10 }
 0x152   : > { %v487_v14 = vpop.f32.mrf.mxu0 }
 0x153   : > { %v576_v15 = vmax.f32 %v486_v12, 0.0 }
 0x154   : > { %v490_v16 = vpop.f32.mrf.mxu0 }
 0x155   : > { %v491_v17 = vadd.f32 %v1506_v49, %v490_v16  ;;  %1080 = vmatmul.mubr.f32.gmra.mxu1 %v576_v15 }
 0x156   : > { %v492_v18 = vpop.f32.mrf.mxu0 }
 0x157   : > { %v577_v20 = vmax.f32 %v491_v17, 0.0 }
 0x158   : > { %v495_v21 = vpop.f32.mrf.mxu0 }
 0x159   : > { %v496_v22 = vadd.f32 %v1506_v49, %v495_v21  ;;  %1082 = vmatprep.mubr.f32.mxu1 %v577_v20 }
 0x15a   : > { %v497_v23 = vpop.f32.mrf.mxu0 }
 0x15b   : > { %v578_v24 = vmax.f32 %v496_v22, 0.0 }
 0x15c   : > { %v500_v26 = vpop.f32.mrf.mxu0 }
 0x15d   : > { %v501_v27 = vadd.f32 %v1506_v49, %v500_v26  ;;  %1083 = vmatmul.mubr.f32.gmra.mxu1 %v578_v24 }
 0x15e   : > { %v502_v28 = vpop.f32.mrf.mxu0 }
 0x15f   : > { %v579_v29 = vmax.f32 %v501_v27, 0.0 }
 0x160   : > { %v505_v30 = vpop.f32.mrf.mxu0 }
 0x161   : > { %v506_v32 = vadd.f32 %v1506_v49, %v505_v30  ;;  %1085 = vmatprep.mubr.f32.mxu1 %v579_v29 }
 0x162   : > { %v507_v33 = vpop.f32.mrf.mxu0 }
 0x163   : > { %v580_v34 = vmax.f32 %v506_v32, 0.0 }
 0x164   : > { %v510_v35 = vpop.f32.mrf.mxu0 }
 0x165   : > { %v511_v36 = vadd.f32 %v1506_v49, %v510_v35  ;;  %1086 = vmatmul.mubr.f32.gmra.mxu1 %v580_v34 }
 0x166   : > { %v512_v37 = vpop.f32.mrf.mxu0 }
 0x167   : > { %v581_v38 = vmax.f32 %v511_v36, 0.0 }
 0x168   : > { %v515_v40 = vpop.f32.mrf.mxu0 }
 0x169   : > { %v516_v41 = vadd.f32 %v1506_v49, %v515_v40  ;;  %1088 = vmatprep.mubr.f32.mxu1 %v581_v38 }
 0x16a   : > { %v517_v42 = vpop.f32.mrf.mxu0 }
 0x16b   : > { %v582_v44 = vmax.f32 %v516_v41, 0.0 }
 0x16d   : > { %1089 = vmatmul.mubr.f32.gmra.mxu1 %v582_v44 }
 0x16e   : > { %1091 = vmatprep.mubr.f32.mxu1 %v583_v45 }
 0x171   : > { %1092 = vmatmul.mubr.f32.gmra.mxu1 %v584_v47 }
 0x172   : > { %1094 = vmatprep.mubr.f32.mxu1 %v585_v53 }
 0x175   : > { %1095 = vmatmul.mubr.f32.gmra.mxu1 %v586_v51 }
 0x176   : > { %1097 = vmatprep.mubr.f32.mxu1 %v587_v52 }
 0x179   : > { %1098 = vmatmul.mubr.f32.gmra.mxu1 %v588_v55 }
 0x17a   : > { %1100 = vmatprep.mubr.f32.mxu1 %v589_v7 }
 0x17d   : > { %1101 = vmatmul.mubr.f32.gmra.mxu1 %v590_v56 }
 0x1d5   : > { %v1057_v25 = vpop.f32.mrf.mxu1 }
 0x1d6   : > { %v686_v19 = vadd.f32 %v1057_v25, %v1567_v13 }
 0x1d7   : > { %v680_v49 = vpop.f32.mrf.mxu1 }
 0x1d8   : > { %v840_v31 = vmax.f32 %v686_v19, 0.0  ;;  %v681_v57 = vadd.f32 %v1567_v13, %v680_v49 }
 0x1da   : > { %873 = vst.msk [vmem:[%s1574_s14 + $0x8] sm:$0xff] %vm871_vm0, %v840_v31  ;;  %v839_v58 = vmax.f32 %v681_v57, 0.0 }
 0x1dc   : > { %872 = vst.msk [vmem:[%s1574_s14] sm:$0xff] %vm871_vm0, %v839_v58 }
 0x1dd   : > { %v1060_v60 = vpop.f32.mrf.mxu1 }
 0x1de   : > { %v696_v61 = vadd.f32 %v1060_v60, %v1567_v13 }
 0x1df   : > { %v690_v62 = vpop.f32.mrf.mxu1 }
 0x1e0   : > { %v842_v63 = vmax.f32 %v696_v61, 0.0  ;;  %v691_v0 = vadd.f32 %v1567_v13, %v690_v62 }
 0x1e2   : > { %875 = vst.msk [vmem:[%s1574_s14 + $0x18] sm:$0xff] %vm871_vm0, %v842_v63  ;;  %v841_v2 = vmax.f32 %v691_v0, 0.0 }
 0x1e4   : > { %874 = vst.msk [vmem:[%s1574_s14 + $0x10] sm:$0xff] %vm871_vm0, %v841_v2 }
 0x1e5   : > { %v1063_v3 = vpop.f32.mrf.mxu1 }
 0x1e6   : > { %v706_v4 = vadd.f32 %v1063_v3, %v1567_v13 }
 0x1e7   : > { %v700_v5 = vpop.f32.mrf.mxu1 }
 0x1e8   : > { %v844_v6 = vmax.f32 %v706_v4, 0.0  ;;  %v701_v8 = vadd.f32 %v1567_v13, %v700_v5 }
 0x1ea   : > { %877 = vst.msk [vmem:[%s1574_s14 + $0x28] sm:$0xff] %vm871_vm0, %v844_v6  ;;  %v843_v9 = vmax.f32 %v701_v8, 0.0 }
 0x1ec   : > { %876 = vst.msk [vmem:[%s1574_s14 + $0x20] sm:$0xff] %vm871_vm0, %v843_v9 }
 0x1ed   : > { %v1066_v10 = vpop.f32.mrf.mxu1 }
 0x1ee   : > { %v716_v11 = vadd.f32 %v1066_v10, %v1567_v13 }
 0x1ef   : > { %v710_v12 = vpop.f32.mrf.mxu1 }
 0x1f0   : > { %v846_v14 = vmax.f32 %v716_v11, 0.0  ;;  %v711_v15 = vadd.f32 %v1567_v13, %v710_v12 }
 0x1f2   : > { %879 = vst.msk [vmem:[%s1574_s14 + $0x38] sm:$0xff] %vm871_vm0, %v846_v14  ;;  %v845_v16 = vmax.f32 %v711_v15, 0.0 }
 0x1f4   : > { %878 = vst.msk [vmem:[%s1574_s14 + $0x30] sm:$0xff] %vm871_vm0, %v845_v16 }
 0x1f5   : > { %v1069_v17 = vpop.f32.mrf.mxu1 }
 0x1f6   : > { %v726_v18 = vadd.f32 %v1069_v17, %v1567_v13 }
 0x1f7   : > { %v720_v20 = vpop.f32.mrf.mxu1 }
 0x1f8   : > { %v848_v21 = vmax.f32 %v726_v18, 0.0  ;;  %v721_v22 = vadd.f32 %v1567_v13, %v720_v20 }
 0x1fa   : > { %881 = vst.msk [vmem:[%s1574_s14 + $0x48] sm:$0xff] %vm871_vm0, %v848_v21  ;;  %v847_v23 = vmax.f32 %v721_v22, 0.0 }
 0x1fc   : > { %880 = vst.msk [vmem:[%s1574_s14 + $0x40] sm:$0xff] %vm871_vm0, %v847_v23 }
 0x1fd   : > { %v1072_v24 = vpop.f32.mrf.mxu1 }
 0x1fe   : > { %v736_v26 = vadd.f32 %v1072_v24, %v1567_v13 }
 0x1ff   : > { %v730_v27 = vpop.f32.mrf.mxu1 }
 0x200   : > { %v850_v28 = vmax.f32 %v736_v26, 0.0  ;;  %v731_v29 = vadd.f32 %v1567_v13, %v730_v27 }
 0x202   : > { %883 = vst.msk [vmem:[%s1574_s14 + $0x58] sm:$0xff] %vm871_vm0, %v850_v28  ;;  %v849_v30 = vmax.f32 %v731_v29, 0.0 }
 0x204   : > { %882 = vst.msk [vmem:[%s1574_s14 + $0x50] sm:$0xff] %vm871_vm0, %v849_v30 }
 0x205   : > { %v1075_v32 = vpop.f32.mrf.mxu1 }
 0x206   : > { %v746_v33 = vadd.f32 %v1075_v32, %v1567_v13 }
 0x207   : > { %v740_v34 = vpop.f32.mrf.mxu1 }
 0x208   : > { %v852_v35 = vmax.f32 %v746_v33, 0.0  ;;  %v741_v36 = vadd.f32 %v1567_v13, %v740_v34 }
 0x20a   : > { %885 = vst.msk [vmem:[%s1574_s14 + $0x68] sm:$0xff] %vm871_vm0, %v852_v35  ;;  %v851_v37 = vmax.f32 %v741_v36, 0.0 }
 0x20c   : > { %884 = vst.msk [vmem:[%s1574_s14 + $0x60] sm:$0xff] %vm871_vm0, %v851_v37 }
 0x20d   : > { %v1078_v38 = vpop.f32.mrf.mxu1 }
 0x20e   : > { %v756_v39 = vadd.f32 %v1078_v38, %v1567_v13 }
 0x20f   : > { %v750_v40 = vpop.f32.mrf.mxu1 }
 0x210   : > { %v854_v41 = vmax.f32 %v756_v39, 0.0  ;;  %v751_v42 = vadd.f32 %v1567_v13, %v750_v40 }
 0x212   : > { %887 = vst.msk [vmem:[%s1574_s14 + $0x78] sm:$0xff] %vm871_vm0, %v854_v41  ;;  %v853_v43 = vmax.f32 %v751_v42, 0.0 }
 0x214   : > { %886 = vst.msk [vmem:[%s1574_s14 + $0x70] sm:$0xff] %vm871_vm0, %v853_v43 }
 0x215   : > { %v1081_v44 = vpop.f32.mrf.mxu1 }
 0x216   : > { %v766_v45 = vadd.f32 %v1081_v44, %v1567_v13 }
 0x217   : > { %v760_v46 = vpop.f32.mrf.mxu1 }
 0x218   : > { %v856_v47 = vmax.f32 %v766_v45, 0.0  ;;  %v761_v48 = vadd.f32 %v1567_v13, %v760_v46 }
 0x21a   : > { %889 = vst.msk [vmem:[%s1574_s14 + $0x88] sm:$0xff] %vm871_vm0, %v856_v47  ;;  %v855_v53 = vmax.f32 %v761_v48, 0.0 }
 0x21c   : > { %888 = vst.msk [vmem:[%s1574_s14 + $0x80] sm:$0xff] %vm871_vm0, %v855_v53 }
 0x21d   : > { %v1084_v50 = vpop.f32.mrf.mxu1 }
 0x21e   : > { %v776_v59 = vadd.f32 %v1084_v50, %v1567_v13 }
 0x21f   : > { %v770_v51 = vpop.f32.mrf.mxu1 }
 0x220   : > { %v858_v1 = vmax.f32 %v776_v59, 0.0  ;;  %v771_v52 = vadd.f32 %v1567_v13, %v770_v51 }
 0x222   : > { %891 = vst.msk [vmem:[%s1574_s14 + $0x98] sm:$0xff] %vm871_vm0, %v858_v1  ;;  %v857_v54 = vmax.f32 %v771_v52, 0.0 }
 0x224   : > { %890 = vst.msk [vmem:[%s1574_s14 + $0x90] sm:$0xff] %vm871_vm0, %v857_v54 }
 0x225   : > { %v1087_v7 = vpop.f32.mrf.mxu1 }
 0x226   : > { %v786_v55 = vadd.f32 %v1087_v7, %v1567_v13 }
 0x227   : > { %v780_v56 = vpop.f32.mrf.mxu1 }
 0x228   : > { %v860_v25 = vmax.f32 %v786_v55, 0.0  ;;  %v781_v19 = vadd.f32 %v1567_v13, %v780_v56 }
 0x22a   : > { %893 = vst.msk [vmem:[%s1574_s14 + $0xa8] sm:$0xff] %vm871_vm0, %v860_v25  ;;  %v859_v49 = vmax.f32 %v781_v19, 0.0 }
 0x22c   : > { %892 = vst.msk [vmem:[%s1574_s14 + $0xa0] sm:$0xff] %vm871_vm0, %v859_v49 }
 0x22d   : > { %v1090_v31 = vpop.f32.mrf.mxu1 }
 0x22e   : > { %v796_v57 = vadd.f32 %v1090_v31, %v1567_v13 }
 0x22f   : > { %v790_v58 = vpop.f32.mrf.mxu1 }
 0x230   : > { %v862_v60 = vmax.f32 %v796_v57, 0.0  ;;  %v791_v61 = vadd.f32 %v1567_v13, %v790_v58 }
 0x231   : > { %v1093_v62 = vpop.f32.mrf.mxu1 }
 0x232   : > { %895 = vst.msk [vmem:[%s1574_s14 + $0xb8] sm:$0xff] %vm871_vm0, %v862_v60  ;;  %v861_v63 = vmax.f32 %v791_v61, 0.0  ;;  %v806_v0 = vadd.f32 %v1093_v62, %v1567_v13 }
 0x233   : > { %v800_v2 = vpop.f32.mrf.mxu1 }
 0x234   : > { %894 = vst.msk [vmem:[%s1574_s14 + $0xb0] sm:$0xff] %vm871_vm0, %v861_v63  ;;  %v864_v3 = vmax.f32 %v806_v0, 0.0  ;;  %v801_v4 = vadd.f32 %v1567_v13, %v800_v2 }
 0x235   : > { %v1096_v5 = vpop.f32.mrf.mxu1 }
 0x236   : > { %897 = vst.msk [vmem:[%s1574_s14 + $0xc8] sm:$0xff] %vm871_vm0, %v864_v3  ;;  %v863_v6 = vmax.f32 %v801_v4, 0.0  ;;  %v816_v8 = vadd.f32 %v1096_v5, %v1567_v13 }
 0x237   : > { %v810_v9 = vpop.f32.mrf.mxu1 }
 0x238   : > { %896 = vst.msk [vmem:[%s1574_s14 + $0xc0] sm:$0xff] %vm871_vm0, %v863_v6  ;;  %v866_v10 = vmax.f32 %v816_v8, 0.0  ;;  %v811_v11 = vadd.f32 %v1567_v13, %v810_v9 }
 0x239   : > { %v1099_v12 = vpop.f32.mrf.mxu1 }
 0x23a   : > { %899 = vst.msk [vmem:[%s1574_s14 + $0xd8] sm:$0xff] %vm871_vm0, %v866_v10  ;;  %v865_v14 = vmax.f32 %v811_v11, 0.0  ;;  %v826_v15 = vadd.f32 %v1099_v12, %v1567_v13 }
 0x23b   : > { %v820_v16 = vpop.f32.mrf.mxu1 }
 0x23c   : > { %898 = vst.msk [vmem:[%s1574_s14 + $0xd0] sm:$0xff] %vm871_vm0, %v865_v14  ;;  %v868_v17 = vmax.f32 %v826_v15, 0.0  ;;  %v821_v18 = vadd.f32 %v1567_v13, %v820_v16 }
 0x23d   : > { %v1102_v20 = vpop.f32.mrf.mxu1 }
 0x23e   : > { %901 = vst.msk [vmem:[%s1574_s14 + $0xe8] sm:$0xff] %vm871_vm0, %v868_v17  ;;  %v867_v21 = vmax.f32 %v821_v18, 0.0  ;;  %v836_v22 = vadd.f32 %v1102_v20, %v1567_v13 }
 0x23f   : > { %v830_v23 = vpop.f32.mrf.mxu1 }
 0x240   : > { %900 = vst.msk [vmem:[%s1574_s14 + $0xe0] sm:$0xff] %vm871_vm0, %v867_v21  ;;  %v870_v24 = vmax.f32 %v836_v22, 0.0  ;;  %v831_v26 = vadd.f32 %v1567_v13, %v830_v23 }
 0x242   : > { %903 = vst.msk [vmem:[%s1574_s14 + $0xf8] sm:$0xff] %vm871_vm0, %v870_v24  ;;  %v869_v27 = vmax.f32 %v831_v26, 0.0 }
 0x244   : > { %902 = vst.msk [vmem:[%s1574_s14 + $0xf0] sm:$0xff] %vm871_vm0, %v869_v27 }
 0x245 PF: > { %s15_s18 = sadd.s32 1, %s1182_s18  }
 0x246   : > { %p12_p4 = scmp.ge.s32.totalorder %s15_s18, 4  }
 0x248   :  { %14 = sbr.rel (!%p12_p4) target bundleno = 1 (0x1), region = 70 }

// kernel: srcnn_forward.3
= control target key start
LH: loop header
LB: loop body
LE: loop exit
PB: predicated region body
PF: predicated region fallthrough
CT: control target
= control target key end

     0   :  { %s1751_s12 = smov 0   ;;  %s2634_s0 = inlined_call_operand.vmem [shape: f32[512,896], index: 0, kind: input, shape index: {}]   ;;  %s2635_s1 = inlined_call_operand.vmem [shape: f32[896,128], index: 1, kind: input, shape index: {}]   ;;  %s2636_s2 = inlined_call_operand.vmem [shape: f32[1,128], index: 2, kind: input, shape index: {}]   ;;  %s2637_s3 = inlined_call_operand.vmem [shape: f32[512,128], index: 3, kind: output, shape index: {}]  }
   0x1 LB: > { %s1508_s13 = sadd.s32 4294967295, %s1728_s12   ;;  %p1512_p0 = scmp.ge.s32.totalorder %s1728_s12, 1  ;;  %s1728_s12 = sphi %s1751_s12, %s13_s12  }
   0x2   : > { %p139_p1 = scmp.lt.s32.totalorder %s1728_s12, 3 }
   0x4   : > { %p140_p2 = pnand %p1512_p0, %p139_p1 }
   0x5   : > { %s1513_s4 = sshll.u32 (!%p140_p2), %s1508_s13, 5 }
   0x6   : > { %143 = sbr.rel (%p140_p2) target bundleno = 496 (0x1f0), region = 32  ;;  %p165_p3 = scmp.lt.s32.totalorder (!%p140_p2), %s1513_s4, 63 }
   0xb   : > { %v416_v0 = vld [vmem:[%s2635_s1 + $0x78] sm:$0xff]  ;;  %v1730_v2 = vmov 0.0   ;;  %v415_v3 = vld [vmem:[%s2635_s1 + $0x70] sm:$0xff]  ;;  %v414_v5 = vld [vmem:[%s2635_s1 + $0x68] sm:$0xff]  ;;  %s2639_s4 = smov (!%p165_p3, %s1513_s4), 63 }
   0xc   : > { %v448_v1 = vld [vmem:[%s2635_s1 + $0x178] sm:$0xff]  ;;  %520 = vmatprep.subr.mxu0 %v1730_v2  ;;  %745 = vmatprep.subr.mxu1 %v1730_v2  ;;  %v447_v4 = vld [vmem:[%s2635_s1 + $0x170] sm:$0xff]  ;;  %v446_v6 = vld [vmem:[%s2635_s1 + $0x168] sm:$0xff]  ;;  %s1712_s26 = smul.u32 56, %s2639_s4 }
   0xd   : > { %521 = vmatpush1.msra.mxu0 %v416_v0  ;;  %746 = vmatpush1.msra.mxu1 %v448_v1  ;;  %v413_v7 = vld [vmem:[%s2635_s1 + $0x60] sm:$0xff]  ;;  %v412_v9 = vld [vmem:[%s2635_s1 + $0x58] sm:$0xff]  ;;  %v411_v11 = vld [vmem:[%s2635_s1 + $0x50] sm:$0xff] }
   0xe   : > { %522 = vmatprep.subr.mxu0 %v1730_v2  ;;  %747 = vmatprep.subr.mxu1 %v1730_v2  ;;  %v445_v8 = vld [vmem:[%s2635_s1 + $0x160] sm:$0xff]  ;;  %v444_v10 = vld [vmem:[%s2635_s1 + $0x158] sm:$0xff]  ;;  %v443_v12 = vld [vmem:[%s2635_s1 + $0x150] sm:$0xff]  ;;  %s2005_s10 = scalar_lea.vmem %s2634_s0, %s1712_s26 }
   0xf   : > { %523 = vmatpush1.msra.mxu0 %v415_v3  ;;  %748 = vmatpush1.msra.mxu1 %v447_v4  ;;  %v410_v13 = vld [vmem:[%s2635_s1 + $0x48] sm:$0xff]  ;;  %v409_v15 = vld [vmem:[%s2635_s1 + $0x40] sm:$0xff]  ;;  %v408_v17 = vld [vmem:[%s2635_s1 + $0x38] sm:$0xff] }
  0x10   : > { %524 = vmatprep.subr.mxu0 %v1730_v2  ;;  %749 = vmatprep.subr.mxu1 %v1730_v2  ;;  %v442_v14 = vld [vmem:[%s2635_s1 + $0x148] sm:$0xff]  ;;  %v441_v16 = vld [vmem:[%s2635_s1 + $0x140] sm:$0xff]  ;;  %v440_v18 = vld [vmem:[%s2635_s1 + $0x138] sm:$0xff] }
  0x11   : > { %525 = vmatpush1.msra.mxu0 %v414_v5  ;;  %750 = vmatpush1.msra.mxu1 %v446_v6  ;;  %v407_v19 = vld [vmem:[%s2635_s1 + $0x30] sm:$0xff]  ;;  %v406_v21 = vld [vmem:[%s2635_s1 + $0x28] sm:$0xff]  ;;  %v405_v23 = vld [vmem:[%s2635_s1 + $0x20] sm:$0xff] }
  0x12   : > { %526 = vmatprep.subr.mxu0 %v1730_v2  ;;  %751 = vmatprep.subr.mxu1 %v1730_v2  ;;  %v439_v20 = vld [vmem:[%s2635_s1 + $0x130] sm:$0xff]  ;;  %v438_v22 = vld [vmem:[%s2635_s1 + $0x128] sm:$0xff]  ;;  %v437_v24 = vld [vmem:[%s2635_s1 + $0x120] sm:$0xff] }
  0x13   : > { %527 = vmatpush1.msra.mxu0 %v413_v7  ;;  %752 = vmatpush1.msra.mxu1 %v445_v8  ;;  %v404_v25 = vld [vmem:[%s2635_s1 + $0x18] sm:$0xff]  ;;  %v403_v27 = vld [vmem:[%s2635_s1 + $0x10] sm:$0xff]  ;;  %v402_v29 = vld [vmem:[%s2635_s1 + $0x8] sm:$0xff] }
  0x14   : > { %528 = vmatprep.subr.mxu0 %v1730_v2  ;;  %753 = vmatprep.subr.mxu1 %v1730_v2  ;;  %v436_v26 = vld [vmem:[%s2635_s1 + $0x118] sm:$0xff]  ;;  %v435_v28 = vld [vmem:[%s2635_s1 + $0x110] sm:$0xff]  ;;  %v434_v30 = vld [vmem:[%s2635_s1 + $0x108] sm:$0xff] }
  0x15   : > { %529 = vmatpush1.msra.mxu0 %v412_v9  ;;  %754 = vmatpush1.msra.mxu1 %v444_v10  ;;  %v401_v31 = vld [vmem:[%s2635_s1] sm:$0xff]  ;;  %v432_v33 = vld [vmem:[%s2635_s1 + $0xf8] sm:$0xff]  ;;  %v431_v35 = vld [vmem:[%s2635_s1 + $0xf0] sm:$0xff] }
  0x16   : > { %530 = vmatprep.subr.mxu0 %v1730_v2  ;;  %755 = vmatprep.subr.mxu1 %v1730_v2  ;;  %v433_v32 = vld [vmem:[%s2635_s1 + $0x100] sm:$0xff]  ;;  %v464_v34 = vld [vmem:[%s2635_s1 + $0x1f8] sm:$0xff]  ;;  %v463_v36 = vld [vmem:[%s2635_s1 + $0x1f0] sm:$0xff] }
  0x17   : > { %531 = vmatpush1.msra.mxu0 %v411_v11  ;;  %756 = vmatpush1.msra.mxu1 %v443_v12  ;;  %v430_v37 = vld [vmem:[%s2635_s1 + $0xe8] sm:$0xff]  ;;  %v429_v39 = vld [vmem:[%s2635_s1 + $0xe0] sm:$0xff]  ;;  %v428_v41 = vld [vmem:[%s2635_s1 + $0xd8] sm:$0xff] }
  0x18   : > { %532 = vmatprep.subr.mxu0 %v1730_v2  ;;  %757 = vmatprep.subr.mxu1 %v1730_v2  ;;  %v462_v38 = vld [vmem:[%s2635_s1 + $0x1e8] sm:$0xff]  ;;  %v461_v40 = vld [vmem:[%s2635_s1 + $0x1e0] sm:$0xff]  ;;  %v460_v42 = vld [vmem:[%s2635_s1 + $0x1d8] sm:$0xff] }
  0x19   : > { %533 = vmatpush1.msra.mxu0 %v410_v13  ;;  %758 = vmatpush1.msra.mxu1 %v442_v14  ;;  %v427_v43 = vld [vmem:[%s2635_s1 + $0xd0] sm:$0xff]  ;;  %v426_v45 = vld [vmem:[%s2635_s1 + $0xc8] sm:$0xff]  ;;  %v425_v47 = vld [vmem:[%s2635_s1 + $0xc0] sm:$0xff] }
  0x1a   : > { %534 = vmatprep.subr.mxu0 %v1730_v2  ;;  %759 = vmatprep.subr.mxu1 %v1730_v2  ;;  %v459_v44 = vld [vmem:[%s2635_s1 + $0x1d0] sm:$0xff]  ;;  %v458_v46 = vld [vmem:[%s2635_s1 + $0x1c8] sm:$0xff]  ;;  %v457_v48 = vld [vmem:[%s2635_s1 + $0x1c0] sm:$0xff] }
  0x1b   : > { %535 = vmatpush1.msra.mxu0 %v409_v15  ;;  %760 = vmatpush1.msra.mxu1 %v441_v16  ;;  %v424_v49 = vld [vmem:[%s2635_s1 + $0xb8] sm:$0xff]  ;;  %v423_v51 = vld [vmem:[%s2635_s1 + $0xb0] sm:$0xff]  ;;  %v422_v53 = vld [vmem:[%s2635_s1 + $0xa8] sm:$0xff] }
  0x1c   : > { %536 = vmatprep.subr.mxu0 %v1730_v2  ;;  %761 = vmatprep.subr.mxu1 %v1730_v2  ;;  %v456_v50 = vld [vmem:[%s2635_s1 + $0x1b8] sm:$0xff]  ;;  %v455_v52 = vld [vmem:[%s2635_s1 + $0x1b0] sm:$0xff]  ;;  %v454_v54 = vld [vmem:[%s2635_s1 + $0x1a8] sm:$0xff] }
  0x1d   : > { %537 = vmatpush1.msra.mxu0 %v408_v17  ;;  %762 = vmatpush1.msra.mxu1 %v440_v18  ;;  %v421_v55 = vld [vmem:[%s2635_s1 + $0xa0] sm:$0xff]  ;;  %v420_v57 = vld [vmem:[%s2635_s1 + $0x98] sm:$0xff]  ;;  %v419_v59 = vld [vmem:[%s2635_s1 + $0x90] sm:$0xff] }
  0x1e   : > { %538 = vmatprep.subr.mxu0 %v1730_v2  ;;  %763 = vmatprep.subr.mxu1 %v1730_v2  ;;  %v453_v56 = vld [vmem:[%s2635_s1 + $0x1a0] sm:$0xff]  ;;  %v452_v58 = vld [vmem:[%s2635_s1 + $0x198] sm:$0xff]  ;;  %v451_v60 = vld [vmem:[%s2635_s1 + $0x190] sm:$0xff] }
  0x1f   : > { %539 = vmatpush1.msra.mxu0 %v407_v19  ;;  %764 = vmatpush1.msra.mxu1 %v439_v20  ;;  %v418_v61 = vld [vmem:[%s2635_s1 + $0x88] sm:$0xff]  ;;  %v417_v63 = vld [vmem:[%s2635_s1 + $0x80] sm:$0xff]  ;;  %v180_v3 = vld [vmem:[%s2005_s10 + $0x18] sm:$0xff] }
  0x20   : > { %540 = vmatprep.subr.mxu0 %v1730_v2  ;;  %765 = vmatprep.subr.mxu1 %v1730_v2  ;;  %v450_v62 = vld [vmem:[%s2635_s1 + $0x188] sm:$0xff]  ;;  %v449_v1 = vld [vmem:[%s2635_s1 + $0x180] sm:$0xff]  ;;  %v179_v5 = vld [vmem:[%s2005_s10 + $0x10] sm:$0xff] }
  0x21   : > { %541 = vmatpush1.msra.mxu0 %v406_v21  ;;  %766 = vmatpush1.msra.mxu1 %v438_v22  ;;  %v178_v0 = vld [vmem:[%s2005_s10 + $0x8] sm:$0xff]  ;;  %v177_v4 = vld [vmem:[%s2005_s10] sm:$0xff]  ;;  %v480_v6 = vld [vmem:[%s2635_s1 + $0x278] sm:$0xff] }
  0x22   : > { %542 = vmatprep.subr.mxu0 %v1730_v2  ;;  %767 = vmatprep.subr.mxu1 %v1730_v2  ;;  %v185_v7 = vld [vmem:[%s2005_s10 + $0x40] sm:$0xff]  ;;  %v187_v8 = vld [vmem:[%s2005_s10 + $0x50] sm:$0xff]  ;;  %v184_v9 = vld [vmem:[%s2005_s10 + $0x38] sm:$0xff] }
  0x23   : > { %543 = vmatpush1.msra.mxu0 %v405_v23  ;;  %768 = vmatpush1.msra.mxu1 %v437_v24  ;;  %v186_v10 = vld [vmem:[%s2005_s10 + $0x48] sm:$0xff]  ;;  %v479_v11 = vld [vmem:[%s2635_s1 + $0x270] sm:$0xff]  ;;  %v192_v12 = vld [vmem:[%s2005_s10 + $0x78] sm:$0xff] }
  0x24   : > { %544 = vmatprep.subr.mxu0 %v1730_v2  ;;  %769 = vmatprep.subr.mxu1 %v1730_v2  ;;  %v194_v13 = vld [vmem:[%s2005_s10 + $0x88] sm:$0xff]  ;;  %v191_v14 = vld [vmem:[%s2005_s10 + $0x70] sm:$0xff]  ;;  %v193_v15 = vld [vmem:[%s2005_s10 + $0x80] sm:$0xff] }
  0x25   : > { %545 = vmatpush1.msra.mxu0 %v404_v25  ;;  %770 = vmatpush1.msra.mxu1 %v436_v26  ;;  %v478_v16 = vld [vmem:[%s2635_s1 + $0x268] sm:$0xff]  ;;  %v199_v17 = vld [vmem:[%s2005_s10 + $0xb0] sm:$0xff]  ;;  %v201_v18 = vld [vmem:[%s2005_s10 + $0xc0] sm:$0xff] }
  0x26   : > { %546 = vmatprep.subr.mxu0 %v1730_v2  ;;  %771 = vmatprep.subr.mxu1 %v1730_v2  ;;  %v198_v19 = vld [vmem:[%s2005_s10 + $0xa8] sm:$0xff]  ;;  %v200_v20 = vld [vmem:[%s2005_s10 + $0xb8] sm:$0xff]  ;;  %v477_v21 = vld [vmem:[%s2635_s1 + $0x260] sm:$0xff] }
  0x27   : > { %547 = vmatpush1.msra.mxu0 %v403_v27  ;;  %772 = vmatpush1.msra.mxu1 %v435_v28  ;;  %v206_v22 = vld [vmem:[%s2005_s10 + $0xe8] sm:$0xff]  ;;  %v208_v23 = vld [vmem:[%s2005_s10 + $0xf8] sm:$0xff]  ;;  %v205_v24 = vld [vmem:[%s2005_s10 + $0xe0] sm:$0xff] }
  0x28   : > { %548 = vmatprep.subr.mxu0 %v1730_v2  ;;  %773 = vmatprep.subr.mxu1 %v1730_v2  ;;  %v207_v25 = vld [vmem:[%s2005_s10 + $0xf0] sm:$0xff]  ;;  %v476_v26 = vld [vmem:[%s2635_s1 + $0x258] sm:$0xff]  ;;  %v213_v27 = vld [vmem:[%s2005_s10 + $0x120] sm:$0xff] }
  0x29   : > { %549 = vmatpush1.msra.mxu0 %v402_v29  ;;  %774 = vmatpush1.msra.mxu1 %v434_v30  ;;  %v215_v28 = vld [vmem:[%s2005_s10 + $0x130] sm:$0xff]  ;;  %v212_v29 = vld [vmem:[%s2005_s10 + $0x118] sm:$0xff]  ;;  %v214_v30 = vld [vmem:[%s2005_s10 + $0x128] sm:$0xff] }
  0x2a   : > { %550 = vmatprep.subr.mxu0 %v1730_v2  ;;  %775 = vmatprep.subr.mxu1 %v1730_v2 }
  0x2b   : > { %551 = vmatpush1.msra.mxu0 %v401_v31  ;;  %776 = vmatpush1.msra.mxu1 %v433_v32  ;;  %v475_v31 = vld [vmem:[%s2635_s1 + $0x250] sm:$0xff]  ;;  %v220_v32 = vld [vmem:[%s2005_s10 + $0x158] sm:$0xff] }
  0x2c   : > { %552 = vmatprep.subr.mxu0 %v1730_v2  ;;  %777 = vmatprep.subr.mxu1 %v1730_v2 }
  0x2d   : > { %553 = vmatpush2.msra.mxu0 %v432_v33  ;;  %778 = vmatpush2.msra.mxu1 %v464_v34  ;;  %v222_v33 = vld [vmem:[%s2005_s10 + $0x168] sm:$0xff]  ;;  %v219_v34 = vld [vmem:[%s2005_s10 + $0x150] sm:$0xff] }
  0x2e   : > { %554 = vmatprep.subr.mxu0 %v1730_v2  ;;  %779 = vmatprep.subr.mxu1 %v1730_v2 }
  0x2f   : > { %555 = vmatpush2.msra.mxu0 %v431_v35  ;;  %780 = vmatpush2.msra.mxu1 %v463_v36  ;;  %v221_v35 = vld [vmem:[%s2005_s10 + $0x160] sm:$0xff]  ;;  %v474_v36 = vld [vmem:[%s2635_s1 + $0x248] sm:$0xff] }
  0x30   : > { %556 = vmatprep.subr.mxu0 %v1730_v2  ;;  %781 = vmatprep.subr.mxu1 %v1730_v2 }
  0x31   : > { %557 = vmatpush2.msra.mxu0 %v430_v37  ;;  %782 = vmatpush2.msra.mxu1 %v462_v38  ;;  %v227_v37 = vld [vmem:[%s2005_s10 + $0x190] sm:$0xff]  ;;  %v229_v38 = vld [vmem:[%s2005_s10 + $0x1a0] sm:$0xff] }
  0x32   : > { %558 = vmatprep.subr.mxu0 %v1730_v2  ;;  %783 = vmatprep.subr.mxu1 %v1730_v2 }
  0x33   : > { %559 = vmatpush2.msra.mxu0 %v429_v39  ;;  %784 = vmatpush2.msra.mxu1 %v461_v40  ;;  %v226_v39 = vld [vmem:[%s2005_s10 + $0x188] sm:$0xff]  ;;  %v228_v40 = vld [vmem:[%s2005_s10 + $0x198] sm:$0xff] }
  0x34   : > { %560 = vmatprep.subr.mxu0 %v1730_v2  ;;  %785 = vmatprep.subr.mxu1 %v1730_v2 }
  0x35   : > { %561 = vmatpush2.msra.mxu0 %v428_v41  ;;  %786 = vmatpush2.msra.mxu1 %v460_v42  ;;  %v473_v41 = vld [vmem:[%s2635_s1 + $0x240] sm:$0xff]  ;;  %v234_v42 = vld [vmem:[%s2005_s10 + $0x1c8] sm:$0xff] }
  0x36   : > { %562 = vmatprep.subr.mxu0 %v1730_v2  ;;  %787 = vmatprep.subr.mxu1 %v1730_v2 }
  0x37   : > { %563 = vmatpush2.msra.mxu0 %v427_v43  ;;  %788 = vmatpush2.msra.mxu1 %v459_v44  ;;  %v236_v43 = vld [vmem:[%s2005_s10 + $0x1d8] sm:$0xff]  ;;  %v233_v44 = vld [vmem:[%s2005_s10 + $0x1c0] sm:$0xff] }
  0x38   : > { %564 = vmatprep.subr.mxu0 %v1730_v2  ;;  %789 = vmatprep.subr.mxu1 %v1730_v2 }
  0x39   : > { %565 = vmatpush2.msra.mxu0 %v426_v45  ;;  %790 = vmatpush2.msra.mxu1 %v458_v46  ;;  %v235_v45 = vld [vmem:[%s2005_s10 + $0x1d0] sm:$0xff]  ;;  %v472_v46 = vld [vmem:[%s2635_s1 + $0x238] sm:$0xff] }
  0x3a   : > { %566 = vmatprep.subr.mxu0 %v1730_v2  ;;  %791 = vmatprep.subr.mxu1 %v1730_v2 }
  0x3b   : > { %567 = vmatpush2.msra.mxu0 %v425_v47  ;;  %792 = vmatpush2.msra.mxu1 %v457_v48  ;;  %v241_v47 = vld [vmem:[%s2005_s10 + $0x200] sm:$0xff]  ;;  %v243_v48 = vld [vmem:[%s2005_s10 + $0x210] sm:$0xff] }
  0x3c   : > { %568 = vmatprep.subr.mxu0 %v1730_v2  ;;  %793 = vmatprep.subr.mxu1 %v1730_v2 }
  0x3d   : > { %569 = vmatpush2.msra.mxu0 %v424_v49  ;;  %794 = vmatpush2.msra.mxu1 %v456_v50  ;;  %v240_v49 = vld [vmem:[%s2005_s10 + $0x1f8] sm:$0xff]  ;;  %v242_v50 = vld [vmem:[%s2005_s10 + $0x208] sm:$0xff] }
  0x3e   : > { %570 = vmatprep.subr.mxu0 %v1730_v2  ;;  %795 = vmatprep.subr.mxu1 %v1730_v2 }
  0x3f   : > { %571 = vmatpush2.msra.mxu0 %v423_v51  ;;  %796 = vmatpush2.msra.mxu1 %v455_v52  ;;  %v471_v51 = vld [vmem:[%s2635_s1 + $0x230] sm:$0xff]  ;;  %v248_v52 = vld [vmem:[%s2005_s10 + $0x238] sm:$0xff] }
  0x40   : > { %572 = vmatprep.subr.mxu0 %v1730_v2  ;;  %797 = vmatprep.subr.mxu1 %v1730_v2 }
  0x41   : > { %573 = vmatpush2.msra.mxu0 %v422_v53  ;;  %798 = vmatpush2.msra.mxu1 %v454_v54  ;;  %v250_v53 = vld [vmem:[%s2005_s10 + $0x248] sm:$0xff]  ;;  %v247_v54 = vld [vmem:[%s2005_s10 + $0x230] sm:$0xff] }
  0x42   : > { %574 = vmatprep.subr.mxu0 %v1730_v2  ;;  %799 = vmatprep.subr.mxu1 %v1730_v2 }
  0x43   : > { %575 = vmatpush2.msra.mxu0 %v421_v55  ;;  %800 = vmatpush2.msra.mxu1 %v453_v56  ;;  %v249_v55 = vld [vmem:[%s2005_s10 + $0x240] sm:$0xff]  ;;  %v470_v56 = vld [vmem:[%s2635_s1 + $0x228] sm:$0xff] }
  0x44   : > { %576 = vmatprep.subr.mxu0 %v1730_v2  ;;  %801 = vmatprep.subr.mxu1 %v1730_v2 }
  0x45   : > { %577 = vmatpush2.msra.mxu0 %v420_v57  ;;  %802 = vmatpush2.msra.mxu1 %v452_v58  ;;  %v255_v57 = vld [vmem:[%s2005_s10 + $0x270] sm:$0xff]  ;;  %v257_v58 = vld [vmem:[%s2005_s10 + $0x280] sm:$0xff] }
  0x46   : > { %578 = vmatprep.subr.mxu0 %v1730_v2  ;;  %803 = vmatprep.subr.mxu1 %v1730_v2 }
  0x47   : > { %579 = vmatpush2.msra.mxu0 %v419_v59  ;;  %804 = vmatpush2.msra.mxu1 %v451_v60  ;;  %v254_v59 = vld [vmem:[%s2005_s10 + $0x268] sm:$0xff]  ;;  %v256_v60 = vld [vmem:[%s2005_s10 + $0x278] sm:$0xff] }
  0x48   : > { %580 = vmatprep.subr.mxu0 %v1730_v2  ;;  %805 = vmatprep.subr.mxu1 %v1730_v2 }
  0x49   : > { %581 = vmatpush2.msra.mxu0 %v418_v61  ;;  %806 = vmatpush2.msra.mxu1 %v450_v62  ;;  %v469_v61 = vld [vmem:[%s2635_s1 + $0x220] sm:$0xff]  ;;  %v262_v62 = vld [vmem:[%s2005_s10 + $0x2a8] sm:$0xff] }
  0x4a   : > { %582 = vmatprep.subr.mxu0 %v1730_v2  ;;  %807 = vmatprep.subr.mxu1 %v1730_v2 }
  0x4b   : > { %583 = vmatpush2.msra.mxu0 %v417_v63  ;;  %584 = vmatprep.mubr.f32.mxu0 %v178_v0  ;;  %v264_v63 = vld [vmem:[%s2005_s10 + $0x2b8] sm:$0xff]  ;;  %v261_v0 = vld [vmem:[%s2005_s10 + $0x2a0] sm:$0xff] }
  0x4c   : > { %808 = vmatpush2.msra.mxu1 %v449_v1  ;;  %809 = vmatprep.mubr.f32.mxu1 %v180_v3  ;;  %v263_v1 = vld [vmem:[%s2005_s10 + $0x2b0] sm:$0xff]  ;;  %v468_v3 = vld [vmem:[%s2635_s1 + $0x218] sm:$0xff] }
  0x4d   : > { %585 = vmatmul.mubr.f32.vlgmr.msra.gmra.mxu0 %v177_v4  ;;  %810 = vmatmul.mubr.f32.vlgmr.msra.gmra.mxu1 %v179_v5  ;;  %v269_v4 = vld [vmem:[%s2005_s10 + $0x2e0] sm:$0xff]  ;;  %v271_v5 = vld [vmem:[%s2005_s10 + $0x2f0] sm:$0xff] }
  0x4e   : > { %970 = vmatprep.subr.mxu0 %v1730_v2  ;;  %1648 = vmatprep.subr.mxu1 %v1730_v2 }
  0x4f   : > { %971 = vmatpush1.msra.mxu0 %v480_v6  ;;  %1680 = vmatpush1.msra.mxu1 %v480_v6  ;;  %v268_v6 = vld [vmem:[%s2005_s10 + $0x2d8] sm:$0xff] }
  0x50   : > { %589 = vmatprep.mubr.f32.mxu0 %v185_v7  ;;  %814 = vmatprep.mubr.f32.mxu1 %v187_v8  ;;  %v270_v7 = vld [vmem:[%s2005_s10 + $0x2e8] sm:$0xff]  ;;  %v467_v8 = vld [vmem:[%s2635_s1 + $0x210] sm:$0xff] }
  0x51   : > { %590 = vmatmul.mubr.f32.gmra.mxu0 %v184_v9  ;;  %815 = vmatmul.mubr.f32.gmra.mxu1 %v186_v10  ;;  %v276_v9 = vld [vmem:[%s2005_s10 + $0x318] sm:$0xff]  ;;  %v278_v10 = vld [vmem:[%s2005_s10 + $0x328] sm:$0xff] }
  0x52   : > { %972 = vmatprep.subr.mxu0 %v1730_v2  ;;  %1649 = vmatprep.subr.mxu1 %v1730_v2 }
  0x53   : > { %973 = vmatpush1.msra.mxu0 %v479_v11  ;;  %1681 = vmatpush1.msra.mxu1 %v479_v11  ;;  %v275_v11 = vld [vmem:[%s2005_s10 + $0x310] sm:$0xff] }
  0x54   : > { %594 = vmatprep.mubr.f32.mxu0 %v192_v12  ;;  %819 = vmatprep.mubr.f32.mxu1 %v194_v13  ;;  %v277_v12 = vld [vmem:[%s2005_s10 + $0x320] sm:$0xff]  ;;  %v466_v13 = vld [vmem:[%s2635_s1 + $0x208] sm:$0xff] }
  0x55   : > { %595 = vmatmul.mubr.f32.gmra.mxu0 %v191_v14  ;;  %820 = vmatmul.mubr.f32.gmra.mxu1 %v193_v15  ;;  %v283_v14 = vld [vmem:[%s2005_s10 + $0x350] sm:$0xff]  ;;  %v285_v15 = vld [vmem:[%s2005_s10 + $0x360] sm:$0xff] }
  0x56   : > { %974 = vmatprep.subr.mxu0 %v1730_v2  ;;  %1650 = vmatprep.subr.mxu1 %v1730_v2 }
  0x57   : > { %975 = vmatpush1.msra.mxu0 %v478_v16  ;;  %1682 = vmatpush1.msra.mxu1 %v478_v16  ;;  %v282_v16 = vld [vmem:[%s2005_s10 + $0x348] sm:$0xff] }
  0x58   : > { %599 = vmatprep.mubr.f32.mxu0 %v199_v17  ;;  %824 = vmatprep.mubr.f32.mxu1 %v201_v18  ;;  %v284_v17 = vld [vmem:[%s2005_s10 + $0x358] sm:$0xff]  ;;  %v465_v18 = vld [vmem:[%s2635_s1 + $0x200] sm:$0xff] }
  0x59   : > { %600 = vmatmul.mubr.f32.gmra.mxu0 %v198_v19  ;;  %825 = vmatmul.mubr.f32.gmra.mxu1 %v200_v20  ;;  %v290_v19 = vld [vmem:[%s2005_s10 + $0x388] sm:$0xff]  ;;  %v292_v20 = vld [vmem:[%s2005_s10 + $0x398] sm:$0xff] }
  0x5a   : > { %976 = vmatprep.subr.mxu0 %v1730_v2  ;;  %1651 = vmatprep.subr.mxu1 %v1730_v2 }
  0x5b   : > { %977 = vmatpush1.msra.mxu0 %v477_v21  ;;  %1683 = vmatpush1.msra.mxu1 %v477_v21  ;;  %v289_v21 = vld [vmem:[%s2005_s10 + $0x380] sm:$0xff] }
  0x5c   : > { %604 = vmatprep.mubr.f32.mxu0 %v206_v22  ;;  %829 = vmatprep.mubr.f32.mxu1 %v208_v23  ;;  %v291_v22 = vld [vmem:[%s2005_s10 + $0x390] sm:$0xff]  ;;  %v496_v23 = vld [vmem:[%s2635_s1 + $0x2f8] sm:$0xff] }
  0x5d   : > { %605 = vmatmul.mubr.f32.gmra.mxu0 %v205_v24  ;;  %830 = vmatmul.mubr.f32.gmra.mxu1 %v207_v25  ;;  %v297_v24 = vld [vmem:[%s2005_s10 + $0x3c0] sm:$0xff]  ;;  %v299_v25 = vld [vmem:[%s2005_s10 + $0x3d0] sm:$0xff] }
  0x5e   : > { %978 = vmatprep.subr.mxu0 %v1730_v2  ;;  %1652 = vmatprep.subr.mxu1 %v1730_v2 }
  0x5f   : > { %979 = vmatpush1.msra.mxu0 %v476_v26  ;;  %1684 = vmatpush1.msra.mxu1 %v476_v26  ;;  %v296_v26 = vld [vmem:[%s2005_s10 + $0x3b8] sm:$0xff] }
  0x60   : > { %609 = vmatprep.mubr.f32.mxu0 %v213_v27  ;;  %834 = vmatprep.mubr.f32.mxu1 %v215_v28  ;;  %v298_v27 = vld [vmem:[%s2005_s10 + $0x3c8] sm:$0xff]  ;;  %v495_v28 = vld [vmem:[%s2635_s1 + $0x2f0] sm:$0xff] }
  0x61   : > { %610 = vmatmul.mubr.f32.gmra.mxu0 %v212_v29  ;;  %835 = vmatmul.mubr.f32.gmra.mxu1 %v214_v30  ;;  %v304_v29 = vld [vmem:[%s2005_s10 + $0x3f8] sm:$0xff]  ;;  %v306_v30 = vld [vmem:[%s2005_s10 + $0x408] sm:$0xff] }
  0x62   : > { %980 = vmatprep.subr.mxu0 %v1730_v2  ;;  %1653 = vmatprep.subr.mxu1 %v1730_v2 }
  0x63   : > { %981 = vmatpush1.msra.mxu0 %v475_v31  ;;  %1685 = vmatpush1.msra.mxu1 %v475_v31  ;;  %v303_v31 = vld [vmem:[%s2005_s10 + $0x3f0] sm:$0xff] }
  0x64   : > { %614 = vmatprep.mubr.f32.mxu0 %v220_v32  ;;  %839 = vmatprep.mubr.f32.mxu1 %v222_v33  ;;  %v305_v32 = vld [vmem:[%s2005_s10 + $0x400] sm:$0xff]  ;;  %v494_v33 = vld [vmem:[%s2635_s1 + $0x2e8] sm:$0xff] }
  0x65   : > { %615 = vmatmul.mubr.f32.gmra.mxu0 %v219_v34  ;;  %840 = vmatmul.mubr.f32.gmra.mxu1 %v221_v35  ;;  %v311_v34 = vld [vmem:[%s2005_s10 + $0x430] sm:$0xff]  ;;  %v313_v35 = vld [vmem:[%s2005_s10 + $0x440] sm:$0xff] }
  0x66   : > { %982 = vmatprep.subr.mxu0 %v1730_v2  ;;  %1654 = vmatprep.subr.mxu1 %v1730_v2 }
  0x67   : > { %983 = vmatpush1.msra.mxu0 %v474_v36  ;;  %1686 = vmatpush1.msra.mxu1 %v474_v36  ;;  %v310_v36 = vld [vmem:[%s2005_s10 + $0x428] sm:$0xff] }
  0x68   : > { %619 = vmatprep.mubr.f32.mxu0 %v227_v37  ;;  %844 = vmatprep.mubr.f32.mxu1 %v229_v38  ;;  %v312_v37 = vld [vmem:[%s2005_s10 + $0x438] sm:$0xff]  ;;  %v493_v38 = vld [vmem:[%s2635_s1 + $0x2e0] sm:$0xff] }
  0x69   : > { %620 = vmatmul.mubr.f32.gmra.mxu0 %v226_v39  ;;  %845 = vmatmul.mubr.f32.gmra.mxu1 %v228_v40  ;;  %v318_v39 = vld [vmem:[%s2005_s10 + $0x468] sm:$0xff]  ;;  %v320_v40 = vld [vmem:[%s2005_s10 + $0x478] sm:$0xff] }
  0x6a   : > { %984 = vmatprep.subr.mxu0 %v1730_v2  ;;  %1655 = vmatprep.subr.mxu1 %v1730_v2 }
  0x6b   : > { %985 = vmatpush1.msra.mxu0 %v473_v41  ;;  %1687 = vmatpush1.msra.mxu1 %v473_v41  ;;  %v317_v41 = vld [vmem:[%s2005_s10 + $0x460] sm:$0xff] }
  0x6c   : > { %624 = vmatprep.mubr.f32.mxu0 %v234_v42  ;;  %849 = vmatprep.mubr.f32.mxu1 %v236_v43  ;;  %v319_v42 = vld [vmem:[%s2005_s10 + $0x470] sm:$0xff]  ;;  %v492_v43 = vld [vmem:[%s2635_s1 + $0x2d8] sm:$0xff] }
  0x6d   : > { %625 = vmatmul.mubr.f32.gmra.mxu0 %v233_v44  ;;  %850 = vmatmul.mubr.f32.gmra.mxu1 %v235_v45  ;;  %v325_v44 = vld [vmem:[%s2005_s10 + $0x4a0] sm:$0xff]  ;;  %v327_v45 = vld [vmem:[%s2005_s10 + $0x4b0] sm:$0xff] }
  0x6e   : > { %986 = vmatprep.subr.mxu0 %v1730_v2  ;;  %1656 = vmatprep.subr.mxu1 %v1730_v2 }
  0x6f   : > { %987 = vmatpush1.msra.mxu0 %v472_v46  ;;  %1688 = vmatpush1.msra.mxu1 %v472_v46  ;;  %v324_v46 = vld [vmem:[%s2005_s10 + $0x498] sm:$0xff] }
  0x70   : > { %629 = vmatprep.mubr.f32.mxu0 %v241_v47  ;;  %854 = vmatprep.mubr.f32.mxu1 %v243_v48  ;;  %v326_v47 = vld [vmem:[%s2005_s10 + $0x4a8] sm:$0xff]  ;;  %v491_v48 = vld [vmem:[%s2635_s1 + $0x2d0] sm:$0xff] }
  0x71   : > { %630 = vmatmul.mubr.f32.gmra.mxu0 %v240_v49  ;;  %855 = vmatmul.mubr.f32.gmra.mxu1 %v242_v50  ;;  %v332_v49 = vld [vmem:[%s2005_s10 + $0x4d8] sm:$0xff]  ;;  %v334_v50 = vld [vmem:[%s2005_s10 + $0x4e8] sm:$0xff] }
  0x72   : > { %988 = vmatprep.subr.mxu0 %v1730_v2  ;;  %1657 = vmatprep.subr.mxu1 %v1730_v2 }
  0x73   : > { %989 = vmatpush1.msra.mxu0 %v471_v51  ;;  %1689 = vmatpush1.msra.mxu1 %v471_v51  ;;  %v331_v51 = vld [vmem:[%s2005_s10 + $0x4d0] sm:$0xff] }
  0x74   : > { %634 = vmatprep.mubr.f32.mxu0 %v248_v52  ;;  %859 = vmatprep.mubr.f32.mxu1 %v250_v53  ;;  %v333_v52 = vld [vmem:[%s2005_s10 + $0x4e0] sm:$0xff]  ;;  %v490_v53 = vld [vmem:[%s2635_s1 + $0x2c8] sm:$0xff] }
  0x75   : > { %635 = vmatmul.mubr.f32.gmra.mxu0 %v247_v54  ;;  %860 = vmatmul.mubr.f32.gmra.mxu1 %v249_v55  ;;  %v339_v54 = vld [vmem:[%s2005_s10 + $0x510] sm:$0xff]  ;;  %v341_v55 = vld [vmem:[%s2005_s10 + $0x520] sm:$0xff] }
  0x76   : > { %990 = vmatprep.subr.mxu0 %v1730_v2  ;;  %1658 = vmatprep.subr.mxu1 %v1730_v2 }
  0x77   : > { %991 = vmatpush1.msra.mxu0 %v470_v56  ;;  %1690 = vmatpush1.msra.mxu1 %v470_v56  ;;  %v338_v56 = vld [vmem:[%s2005_s10 + $0x508] sm:$0xff] }
  0x78   : > { %639 = vmatprep.mubr.f32.mxu0 %v255_v57  ;;  %864 = vmatprep.mubr.f32.mxu1 %v257_v58  ;;  %v340_v57 = vld [vmem:[%s2005_s10 + $0x518] sm:$0xff]  ;;  %v489_v58 = vld [vmem:[%s2635_s1 + $0x2c0] sm:$0xff] }
  0x79   : > { %640 = vmatmul.mubr.f32.gmra.mxu0 %v254_v59  ;;  %865 = vmatmul.mubr.f32.gmra.mxu1 %v256_v60  ;;  %v346_v59 = vld [vmem:[%s2005_s10 + $0x548] sm:$0xff]  ;;  %v348_v60 = vld [vmem:[%s2005_s10 + $0x558] sm:$0xff] }
  0x7a   : > { %992 = vmatprep.subr.mxu0 %v1730_v2  ;;  %1659 = vmatprep.subr.mxu1 %v1730_v2 }
  0x7b   : > { %993 = vmatpush1.msra.mxu0 %v469_v61  ;;  %1691 = vmatpush1.msra.mxu1 %v469_v61  ;;  %v345_v61 = vld [vmem:[%s2005_s10 + $0x540] sm:$0xff] }
  0x7c   : > { %644 = vmatprep.mubr.f32.mxu0 %v262_v62  ;;  %869 = vmatprep.mubr.f32.mxu1 %v264_v63  ;;  %v347_v62 = vld [vmem:[%s2005_s10 + $0x550] sm:$0xff]  ;;  %v488_v63 = vld [vmem:[%s2635_s1 + $0x2b8] sm:$0xff] }
  0x7d   : > { %645 = vmatmul.mubr.f32.gmra.mxu0 %v261_v0  ;;  %870 = vmatmul.mubr.f32.gmra.mxu1 %v263_v1  ;;  %v353_v0 = vld [vmem:[%s2005_s10 + $0x580] sm:$0xff]  ;;  %v355_v1 = vld [vmem:[%s2005_s10 + $0x590] sm:$0xff] }
  0x7e   : > { %994 = vmatprep.subr.mxu0 %v1730_v2  ;;  %1660 = vmatprep.subr.mxu1 %v1730_v2 }
  0x7f   : > { %995 = vmatpush1.msra.mxu0 %v468_v3  ;;  %1692 = vmatpush1.msra.mxu1 %v468_v3  ;;  %v352_v3 = vld [vmem:[%s2005_s10 + $0x578] sm:$0xff] }
  0x80   : > { %649 = vmatprep.mubr.f32.mxu0 %v269_v4  ;;  %874 = vmatprep.mubr.f32.mxu1 %v271_v5  ;;  %v354_v4 = vld [vmem:[%s2005_s10 + $0x588] sm:$0xff]  ;;  %v487_v5 = vld [vmem:[%s2635_s1 + $0x2b0] sm:$0xff] }
  0x81   : > { %650 = vmatmul.mubr.f32.gmra.mxu0 %v268_v6  ;;  %875 = vmatmul.mubr.f32.gmra.mxu1 %v270_v7  ;;  %v360_v6 = vld [vmem:[%s2005_s10 + $0x5b8] sm:$0xff]  ;;  %v362_v7 = vld [vmem:[%s2005_s10 + $0x5c8] sm:$0xff] }
  0x82   : > { %996 = vmatprep.subr.mxu0 %v1730_v2  ;;  %1661 = vmatprep.subr.mxu1 %v1730_v2 }
  0x83   : > { %997 = vmatpush1.msra.mxu0 %v467_v8  ;;  %1693 = vmatpush1.msra.mxu1 %v467_v8  ;;  %v359_v8 = vld [vmem:[%s2005_s10 + $0x5b0] sm:$0xff] }
  0x84   : > { %654 = vmatprep.mubr.f32.mxu0 %v276_v9  ;;  %879 = vmatprep.mubr.f32.mxu1 %v278_v10  ;;  %v361_v9 = vld [vmem:[%s2005_s10 + $0x5c0] sm:$0xff]  ;;  %v486_v10 = vld [vmem:[%s2635_s1 + $0x2a8] sm:$0xff] }
  0x85   : > { %655 = vmatmul.mubr.f32.gmra.mxu0 %v275_v11  ;;  %880 = vmatmul.mubr.f32.gmra.mxu1 %v277_v12  ;;  %v367_v11 = vld [vmem:[%s2005_s10 + $0x5f0] sm:$0xff]  ;;  %v369_v12 = vld [vmem:[%s2005_s10 + $0x600] sm:$0xff] }
  0x86   : > { %998 = vmatprep.subr.mxu0 %v1730_v2  ;;  %1662 = vmatprep.subr.mxu1 %v1730_v2 }
  0x87   : > { %999 = vmatpush1.msra.mxu0 %v466_v13  ;;  %1694 = vmatpush1.msra.mxu1 %v466_v13  ;;  %v366_v13 = vld [vmem:[%s2005_s10 + $0x5e8] sm:$0xff] }
  0x88   : > { %659 = vmatprep.mubr.f32.mxu0 %v283_v14  ;;  %884 = vmatprep.mubr.f32.mxu1 %v285_v15  ;;  %v368_v14 = vld [vmem:[%s2005_s10 + $0x5f8] sm:$0xff]  ;;  %v485_v15 = vld [vmem:[%s2635_s1 + $0x2a0] sm:$0xff] }
  0x89   : > { %660 = vmatmul.mubr.f32.gmra.mxu0 %v282_v16  ;;  %885 = vmatmul.mubr.f32.gmra.mxu1 %v284_v17  ;;  %v374_v16 = vld [vmem:[%s2005_s10 + $0x628] sm:$0xff]  ;;  %v376_v17 = vld [vmem:[%s2005_s10 + $0x638] sm:$0xff] }
  0x8a   : > { %1000 = vmatprep.subr.mxu0 %v1730_v2  ;;  %1663 = vmatprep.subr.mxu1 %v1730_v2 }
  0x8b   : > { %1001 = vmatpush1.msra.mxu0 %v465_v18  ;;  %1695 = vmatpush1.msra.mxu1 %v465_v18  ;;  %v373_v18 = vld [vmem:[%s2005_s10 + $0x620] sm:$0xff] }
  0x8c   : > { %664 = vmatprep.mubr.f32.mxu0 %v290_v19  ;;  %889 = vmatprep.mubr.f32.mxu1 %v292_v20  ;;  %v375_v19 = vld [vmem:[%s2005_s10 + $0x630] sm:$0xff]  ;;  %v484_v20 = vld [vmem:[%s2635_s1 + $0x298] sm:$0xff] }
  0x8d   : > { %665 = vmatmul.mubr.f32.gmra.mxu0 %v289_v21  ;;  %890 = vmatmul.mubr.f32.gmra.mxu1 %v291_v22  ;;  %v381_v21 = vld [vmem:[%s2005_s10 + $0x660] sm:$0xff]  ;;  %v383_v22 = vld [vmem:[%s2005_s10 + $0x670] sm:$0xff] }
  0x8e   : > { %1002 = vmatprep.subr.mxu0 %v1730_v2  ;;  %1664 = vmatprep.subr.mxu1 %v1730_v2 }
  0x8f   : > { %1003 = vmatpush2.msra.mxu0 %v496_v23  ;;  %1696 = vmatpush2.msra.mxu1 %v496_v23  ;;  %v380_v23 = vld [vmem:[%s2005_s10 + $0x658] sm:$0xff] }
  0x90   : > { %669 = vmatprep.mubr.f32.mxu0 %v297_v24  ;;  %894 = vmatprep.mubr.f32.mxu1 %v299_v25  ;;  %v382_v24 = vld [vmem:[%s2005_s10 + $0x668] sm:$0xff]  ;;  %v483_v25 = vld [vmem:[%s2635_s1 + $0x290] sm:$0xff] }
  0x91   : > { %670 = vmatmul.mubr.f32.gmra.mxu0 %v296_v26  ;;  %895 = vmatmul.mubr.f32.gmra.mxu1 %v298_v27  ;;  %v388_v26 = vld [vmem:[%s2005_s10 + $0x698] sm:$0xff]  ;;  %v390_v27 = vld [vmem:[%s2005_s10 + $0x6a8] sm:$0xff] }
  0x92   : > { %1004 = vmatprep.subr.mxu0 %v1730_v2  ;;  %1665 = vmatprep.subr.mxu1 %v1730_v2 }
  0x93   : > { %1005 = vmatpush2.msra.mxu0 %v495_v28  ;;  %1697 = vmatpush2.msra.mxu1 %v495_v28  ;;  %v387_v28 = vld [vmem:[%s2005_s10 + $0x690] sm:$0xff] }
  0x94   : > { %674 = vmatprep.mubr.f32.mxu0 %v304_v29  ;;  %899 = vmatprep.mubr.f32.mxu1 %v306_v30  ;;  %v389_v29 = vld [vmem:[%s2005_s10 + $0x6a0] sm:$0xff]  ;;  %v482_v30 = vld [vmem:[%s2635_s1 + $0x288] sm:$0xff] }
  0x95   : > { %675 = vmatmul.mubr.f32.gmra.mxu0 %v303_v31  ;;  %900 = vmatmul.mubr.f32.gmra.mxu1 %v305_v32  ;;  %v395_v31 = vld [vmem:[%s2005_s10 + $0x6d0] sm:$0xff]  ;;  %v397_v32 = vld [vmem:[%s2005_s10 + $0x6e0] sm:$0xff] }
  0x96   : > { %1006 = vmatprep.subr.mxu0 %v1730_v2  ;;  %1666 = vmatprep.subr.mxu1 %v1730_v2 }
  0x97   : > { %1007 = vmatpush2.msra.mxu0 %v494_v33  ;;  %1698 = vmatpush2.msra.mxu1 %v494_v33  ;;  %v394_v33 = vld [vmem:[%s2005_s10 + $0x6c8] sm:$0xff] }
  0x98   : > { %679 = vmatprep.mubr.f32.mxu0 %v311_v34  ;;  %904 = vmatprep.mubr.f32.mxu1 %v313_v35  ;;  %v396_v34 = vld [vmem:[%s2005_s10 + $0x6d8] sm:$0xff]  ;;  %v481_v35 = vld [vmem:[%s2635_s1 + $0x280] sm:$0xff] }
  0x99   : > { %680 = vmatmul.mubr.f32.gmra.mxu0 %v310_v36  ;;  %905 = vmatmul.mubr.f32.gmra.mxu1 %v312_v37  ;;  %v182_v36 = vld [vmem:[%s2005_s10 + $0x28] sm:$0xff] }
  0x9a   : > { %1008 = vmatprep.subr.mxu0 %v1730_v2  ;;  %1667 = vmatprep.subr.mxu1 %v1730_v2  ;;  %v350_v37 = vld [vmem:[%s2005_s10 + $0x568] sm:$0xff] }
  0x9b   : > { %1009 = vmatpush2.msra.mxu0 %v493_v38  ;;  %1699 = vmatpush2.msra.mxu1 %v493_v38  ;;  %v181_v38 = vld [vmem:[%s2005_s10 + $0x20] sm:$0xff] }
  0x9c   : > { %684 = vmatprep.mubr.f32.mxu0 %v318_v39  ;;  %909 = vmatprep.mubr.f32.mxu1 %v320_v40  ;;  %v349_v39 = vld [vmem:[%s2005_s10 + $0x560] sm:$0xff]  ;;  %v512_v40 = vld [vmem:[%s2635_s1 + $0x378] sm:$0xff] }
  0x9d   : > { %685 = vmatmul.mubr.f32.gmra.mxu0 %v317_v41  ;;  %910 = vmatmul.mubr.f32.gmra.mxu1 %v319_v42  ;;  %v189_v41 = vld [vmem:[%s2005_s10 + $0x60] sm:$0xff] }
  0x9e   : > { %1010 = vmatprep.subr.mxu0 %v1730_v2  ;;  %1668 = vmatprep.subr.mxu1 %v1730_v2  ;;  %v357_v42 = vld [vmem:[%s2005_s10 + $0x5a0] sm:$0xff] }
  0x9f   : > { %1011 = vmatpush2.msra.mxu0 %v492_v43  ;;  %1700 = vmatpush2.msra.mxu1 %v492_v43  ;;  %v188_v43 = vld [vmem:[%s2005_s10 + $0x58] sm:$0xff] }
  0xa0   : > { %689 = vmatprep.mubr.f32.mxu0 %v325_v44  ;;  %914 = vmatprep.mubr.f32.mxu1 %v327_v45  ;;  %v356_v44 = vld [vmem:[%s2005_s10 + $0x598] sm:$0xff]  ;;  %v510_v45 = vld [vmem:[%s2635_s1 + $0x368] sm:$0xff] }
  0xa1   : > { %690 = vmatmul.mubr.f32.gmra.mxu0 %v324_v46  ;;  %915 = vmatmul.mubr.f32.gmra.mxu1 %v326_v47  ;;  %v196_v46 = vld [vmem:[%s2005_s10 + $0x98] sm:$0xff]  ;;  %v509_v47 = vld [vmem:[%s2635_s1 + $0x360] sm:$0xff] }
  0xa2   : > { %1012 = vmatprep.subr.mxu0 %v1730_v2  ;;  %1669 = vmatprep.subr.mxu1 %v1730_v2 }
  0xa3   : > { %1013 = vmatpush2.msra.mxu0 %v491_v48  ;;  %1701 = vmatpush2.msra.mxu1 %v491_v48  ;;  %v364_v48 = vld [vmem:[%s2005_s10 + $0x5d8] sm:$0xff] }
  0xa4   : > { %694 = vmatprep.mubr.f32.mxu0 %v332_v49  ;;  %919 = vmatprep.mubr.f32.mxu1 %v334_v50  ;;  %v195_v49 = vld [vmem:[%s2005_s10 + $0x90] sm:$0xff] }
  0xa5   : > { %695 = vmatmul.mubr.f32.gmra.mxu0 %v331_v51  ;;  %920 = vmatmul.mubr.f32.gmra.mxu1 %v333_v52  ;;  %v363_v50 = vld [vmem:[%s2005_s10 + $0x5d0] sm:$0xff]  ;;  %v508_v51 = vld [vmem:[%s2635_s1 + $0x358] sm:$0xff] }
  0xa6   : > { %1014 = vmatprep.subr.mxu0 %v1730_v2  ;;  %1670 = vmatprep.subr.mxu1 %v1730_v2  ;;  %v203_v52 = vld [vmem:[%s2005_s10 + $0xd0] sm:$0xff] }
  0xa7   : > { %1015 = vmatpush2.msra.mxu0 %v490_v53  ;;  %1702 = vmatpush2.msra.mxu1 %v490_v53  ;;  %v507_v53 = vld [vmem:[%s2635_s1 + $0x350] sm:$0xff] }
  0xa8   : > { %699 = vmatprep.mubr.f32.mxu0 %v339_v54  ;;  %924 = vmatprep.mubr.f32.mxu1 %v341_v55  ;;  %v371_v54 = vld [vmem:[%s2005_s10 + $0x610] sm:$0xff]  ;;  %v202_v55 = vld [vmem:[%s2005_s10 + $0xc8] sm:$0xff] }
  0xa9   : > { %700 = vmatmul.mubr.f32.gmra.mxu0 %v338_v56  ;;  %925 = vmatmul.mubr.f32.gmra.mxu1 %v340_v57  ;;  %v370_v56 = vld [vmem:[%s2005_s10 + $0x608] sm:$0xff] }
  0xaa   : > { %1016 = vmatprep.subr.mxu0 %v1730_v2  ;;  %1671 = vmatprep.subr.mxu1 %v1730_v2  ;;  %v506_v57 = vld [vmem:[%s2635_s1 + $0x348] sm:$0xff] }
  0xab   : > { %1017 = vmatpush2.msra.mxu0 %v489_v58  ;;  %1703 = vmatpush2.msra.mxu1 %v489_v58  ;;  %v210_v58 = vld [vmem:[%s2005_s10 + $0x108] sm:$0xff] }
  0xac   : > { %704 = vmatprep.mubr.f32.mxu0 %v346_v59  ;;  %929 = vmatprep.mubr.f32.mxu1 %v348_v60  ;;  %v505_v59 = vld [vmem:[%s2635_s1 + $0x340] sm:$0xff]  ;;  %v378_v60 = vld [vmem:[%s2005_s10 + $0x648] sm:$0xff] }
  0xad   : > { %705 = vmatmul.mubr.f32.gmra.mxu0 %v345_v61  ;;  %930 = vmatmul.mubr.f32.gmra.mxu1 %v347_v62  ;;  %v209_v61 = vld [vmem:[%s2005_s10 + $0x100] sm:$0xff] }
  0xae   : > { %1018 = vmatprep.subr.mxu0 %v1730_v2  ;;  %1672 = vmatprep.subr.mxu1 %v1730_v2  ;;  %v377_v62 = vld [vmem:[%s2005_s10 + $0x640] sm:$0xff] }
  0xaf   : > { %1019 = vmatpush2.msra.mxu0 %v488_v63  ;;  %1704 = vmatpush2.msra.mxu1 %v488_v63  ;;  %v504_v63 = vld [vmem:[%s2635_s1 + $0x338] sm:$0xff] }
  0xb0   : > { %709 = vmatprep.mubr.f32.mxu0 %v353_v0  ;;  %934 = vmatprep.mubr.f32.mxu1 %v355_v1  ;;  %v217_v0 = vld [vmem:[%s2005_s10 + $0x140] sm:$0xff]  ;;  %v503_v1 = vld [vmem:[%s2635_s1 + $0x330] sm:$0xff] }
  0xb1   : > { %710 = vmatmul.mubr.f32.gmra.mxu0 %v352_v3  ;;  %935 = vmatmul.mubr.f32.gmra.mxu1 %v354_v4  ;;  %v385_v3 = vld [vmem:[%s2005_s10 + $0x680] sm:$0xff]  ;;  %v216_v4 = vld [vmem:[%s2005_s10 + $0x138] sm:$0xff] }
  0xb2   : > { %1020 = vmatprep.subr.mxu0 %v1730_v2  ;;  %1673 = vmatprep.subr.mxu1 %v1730_v2 }
  0xb3   : > { %1021 = vmatpush2.msra.mxu0 %v487_v5  ;;  %1705 = vmatpush2.msra.mxu1 %v487_v5  ;;  %v384_v5 = vld [vmem:[%s2005_s10 + $0x678] sm:$0xff] }
  0xb4   : > { %714 = vmatprep.mubr.f32.mxu0 %v360_v6  ;;  %939 = vmatprep.mubr.f32.mxu1 %v362_v7  ;;  %v502_v6 = vld [vmem:[%s2635_s1 + $0x328] sm:$0xff]  ;;  %v224_v7 = vld [vmem:[%s2005_s10 + $0x178] sm:$0xff] }
  0xb5   : > { %715 = vmatmul.mubr.f32.gmra.mxu0 %v359_v8  ;;  %940 = vmatmul.mubr.f32.gmra.mxu1 %v361_v9  ;;  %v501_v8 = vld [vmem:[%s2635_s1 + $0x320] sm:$0xff]  ;;  %v392_v9 = vld [vmem:[%s2005_s10 + $0x6b8] sm:$0xff] }
  0xb6   : > { %1022 = vmatprep.subr.mxu0 %v1730_v2  ;;  %1674 = vmatprep.subr.mxu1 %v1730_v2 }
  0xb7   : > { %1023 = vmatpush2.msra.mxu0 %v486_v10  ;;  %1706 = vmatpush2.msra.mxu1 %v486_v10  ;;  %v223_v10 = vld [vmem:[%s2005_s10 + $0x170] sm:$0xff] }
  0xb8   : > { %719 = vmatprep.mubr.f32.mxu0 %v367_v11  ;;  %944 = vmatprep.mubr.f32.mxu1 %v369_v12  ;;  %v391_v11 = vld [vmem:[%s2005_s10 + $0x6b0] sm:$0xff]  ;;  %v500_v12 = vld [vmem:[%s2635_s1 + $0x318] sm:$0xff] }
  0xb9   : > { %720 = vmatmul.mubr.f32.gmra.mxu0 %v366_v13  ;;  %945 = vmatmul.mubr.f32.gmra.mxu1 %v368_v14  ;;  %v231_v13 = vld [vmem:[%s2005_s10 + $0x1b0] sm:$0xff] }
  0xba   : > { %1024 = vmatprep.subr.mxu0 %v1730_v2  ;;  %1675 = vmatprep.subr.mxu1 %v1730_v2  ;;  %v499_v14 = vld [vmem:[%s2635_s1 + $0x310] sm:$0xff] }
  0xbb   : > { %1025 = vmatpush2.msra.mxu0 %v485_v15  ;;  %1707 = vmatpush2.msra.mxu1 %v485_v15  ;;  %v399_v15 = vld [vmem:[%s2005_s10 + $0x6f0] sm:$0xff] }
  0xbc   : > { %724 = vmatprep.mubr.f32.mxu0 %v374_v16  ;;  %949 = vmatprep.mubr.f32.mxu1 %v376_v17  ;;  %v230_v16 = vld [vmem:[%s2005_s10 + $0x1a8] sm:$0xff] }
  0xbd   : > { %725 = vmatmul.mubr.f32.gmra.mxu0 %v373_v18  ;;  %950 = vmatmul.mubr.f32.gmra.mxu1 %v375_v19  ;;  %v398_v17 = vld [vmem:[%s2005_s10 + $0x6e8] sm:$0xff] }
  0xbe   : > { %1026 = vmatprep.subr.mxu0 %v1730_v2  ;;  %1676 = vmatprep.subr.mxu1 %v1730_v2  ;;  %v498_v18 = vld [vmem:[%s2635_s1 + $0x308] sm:$0xff] }
  0xbf   : > { %1027 = vmatpush2.msra.mxu0 %v484_v20  ;;  %1708 = vmatpush2.msra.mxu1 %v484_v20  ;;  %v238_v19 = vld [vmem:[%s2005_s10 + $0x1e8] sm:$0xff]  ;;  %v497_v20 = vld [vmem:[%s2635_s1 + $0x300] sm:$0xff] }
  0xc0   : > { %729 = vmatprep.mubr.f32.mxu0 %v381_v21  ;;  %954 = vmatprep.mubr.f32.mxu1 %v383_v22  ;;  %v183_v21 = vld [vmem:[%s2005_s10 + $0x30] sm:$0xff]  ;;  %v237_v22 = vld [vmem:[%s2005_s10 + $0x1e0] sm:$0xff] }
  0xc1   : > { %730 = vmatmul.mubr.f32.gmra.mxu0 %v380_v23  ;;  %955 = vmatmul.mubr.f32.gmra.mxu1 %v382_v24  ;;  %v190_v23 = vld [vmem:[%s2005_s10 + $0x68] sm:$0xff]  ;;  %v245_v24 = vld [vmem:[%s2005_s10 + $0x220] sm:$0xff] }
  0xc2   : > { %1028 = vmatprep.subr.mxu0 %v1730_v2  ;;  %1677 = vmatprep.subr.mxu1 %v1730_v2 }
  0xc3   : > { %1029 = vmatpush2.msra.mxu0 %v483_v25  ;;  %1709 = vmatpush2.msra.mxu1 %v483_v25  ;;  %v197_v25 = vld [vmem:[%s2005_s10 + $0xa0] sm:$0xff] }
  0xc4   : > { %734 = vmatprep.mubr.f32.mxu0 %v388_v26  ;;  %959 = vmatprep.mubr.f32.mxu1 %v390_v27  ;;  %v244_v26 = vld [vmem:[%s2005_s10 + $0x218] sm:$0xff] }
  0xc5   : > { %735 = vmatmul.mubr.f32.gmra.mxu0 %v387_v28  ;;  %960 = vmatmul.mubr.f32.gmra.mxu1 %v389_v29  ;;  %v204_v27 = vld [vmem:[%s2005_s10 + $0xd8] sm:$0xff]  ;;  %v211_v29 = vld [vmem:[%s2005_s10 + $0x110] sm:$0xff] }
  0xc6   : > { %1030 = vmatprep.subr.mxu0 %v1730_v2  ;;  %1678 = vmatprep.subr.mxu1 %v1730_v2  ;;  %v252_v28 = vld [vmem:[%s2005_s10 + $0x258] sm:$0xff] }
  0xc7   : > { %1031 = vmatpush2.msra.mxu0 %v482_v30  ;;  %1710 = vmatpush2.msra.mxu1 %v482_v30  ;;  %v251_v30 = vld [vmem:[%s2005_s10 + $0x250] sm:$0xff] }
  0xc8   : > { %739 = vmatprep.mubr.f32.mxu0 %v395_v31  ;;  %964 = vmatprep.mubr.f32.mxu1 %v397_v32  ;;  %v218_v31 = vld [vmem:[%s2005_s10 + $0x148] sm:$0xff]  ;;  %v259_v32 = vld [vmem:[%s2005_s10 + $0x290] sm:$0xff] }
  0xc9   : > { %740 = vmatmul.mubr.f32.gmra.mxu0 %v394_v33  ;;  %965 = vmatmul.mubr.f32.gmra.mxu1 %v396_v34  ;;  %v225_v33 = vld [vmem:[%s2005_s10 + $0x180] sm:$0xff]  ;;  %v258_v34 = vld [vmem:[%s2005_s10 + $0x288] sm:$0xff] }
  0xca   : > { %1032 = vmatprep.subr.mxu0 %v1730_v2  ;;  %1679 = vmatprep.subr.mxu1 %v1730_v2  ;;  %v511_v2 = vld [vmem:[%s2635_s1 + $0x370] sm:$0xff] }
  0xcb   : > { %1033 = vmatpush2.msra.mxu0 %v481_v35  ;;  %1711 = vmatpush2.msra.mxu1 %v481_v35  ;;  %v232_v35 = vld [vmem:[%s2005_s10 + $0x1b8] sm:$0xff] }
  0xcc   : > { %1034 = vmatprep.mubr.f32.mxu0 %v182_v36  ;;  %1154 = vmatprep.mubr.f32.mxu1 %v350_v37  ;;  %v266_v36 = vld [vmem:[%s2005_s10 + $0x2c8] sm:$0xff]  ;;  %v239_v37 = vld [vmem:[%s2005_s10 + $0x1f0] sm:$0xff] }
  0xcd   : > { %1035 = vmatmul.mubr.f32.vlgmr.msra.gmra.mxu0 %v181_v38  ;;  %1155 = vmatmul.mubr.f32.vlgmr.msra.gmra.mxu1 %v349_v39  ;;  %v265_v38 = vld [vmem:[%s2005_s10 + $0x2c0] sm:$0xff]  ;;  %v246_v39 = vld [vmem:[%s2005_s10 + $0x228] sm:$0xff] }
  0xce   : > { %1568 = vmatprep.subr.mxu1 %v512_v40  ;;  %1039 = vmatprep.mubr.f32.mxu0 %v189_v41  ;;  %v253_v41 = vld [vmem:[%s2005_s10 + $0x260] sm:$0xff] }
  0xcf   : > { %1569 = vmatpush3.msra.mxu1 %v512_v40  ;;  %1159 = vmatprep.mubr.f32.mxu1 %v357_v42  ;;  %v273_v40 = vld [vmem:[%s2005_s10 + $0x300] sm:$0xff]  ;;  %v272_v42 = vld [vmem:[%s2005_s10 + $0x2f8] sm:$0xff] }
  0xd0   : > { %1570 = vmatprep.subr.mxu1 %v511_v2 }
  0xd1   : > { %1571 = vmatpush3.msra.mxu1 %v511_v2  ;;  %1040 = vmatmul.mubr.f32.gmra.mxu0 %v188_v43  ;;  %v260_v2 = vld [vmem:[%s2005_s10 + $0x298] sm:$0xff] }
  0xd2   : > { %1160 = vmatmul.mubr.f32.gmra.mxu1 %v356_v44  ;;  %1572 = vmatprep.subr.mxu1 %v510_v45  ;;  %v280_v43 = vld [vmem:[%s2005_s10 + $0x338] sm:$0xff]  ;;  %v267_v44 = vld [vmem:[%s2005_s10 + $0x2d0] sm:$0xff] }
  0xd3   : > { %1573 = vmatpush3.msra.mxu1 %v510_v45  ;;  %1044 = vmatprep.mubr.f32.mxu0 %v196_v46  ;;  %v279_v45 = vld [vmem:[%s2005_s10 + $0x330] sm:$0xff]  ;;  %v274_v46 = vld [vmem:[%s2005_s10 + $0x308] sm:$0xff] }
  0xd4   : > { %1574 = vmatprep.subr.mxu1 %v509_v47  ;;  %1164 = vmatprep.mubr.f32.mxu1 %v364_v48  ;;  %v281_v48 = vld [vmem:[%s2005_s10 + $0x340] sm:$0xff] }
  0xd5   : > { %1575 = vmatpush3.msra.mxu1 %v509_v47  ;;  %1045 = vmatmul.mubr.f32.gmra.mxu0 %v195_v49  ;;  %v287_v47 = vld [vmem:[%s2005_s10 + $0x370] sm:$0xff]  ;;  %v286_v49 = vld [vmem:[%s2005_s10 + $0x368] sm:$0xff] }
  0xd6   : > { %1165 = vmatmul.mubr.f32.gmra.mxu1 %v363_v50  ;;  %1576 = vmatprep.subr.mxu1 %v508_v51  ;;  %v288_v50 = vld [vmem:[%s2005_s10 + $0x378] sm:$0xff] }
  0xd7   : > { %1577 = vmatpush3.msra.mxu1 %v508_v51  ;;  %1049 = vmatprep.mubr.f32.mxu0 %v203_v52  ;;  %v294_v51 = vld [vmem:[%s2005_s10 + $0x3a8] sm:$0xff]  ;;  %v295_v52 = vld [vmem:[%s2005_s10 + $0x3b0] sm:$0xff] }
  0xd8   : > { %1578 = vmatprep.subr.mxu1 %v507_v53  ;;  %1169 = vmatprep.mubr.f32.mxu1 %v371_v54  ;;  %v2431_v54 = vld [vmem:[%s2636_s2] ss:$0 sm:$0xff] }
  0xd9   : > { %1579 = vmatpush3.msra.mxu1 %v507_v53  ;;  %1050 = vmatmul.mubr.f32.gmra.mxu0 %v202_v55  ;;  %v293_v53 = vld [vmem:[%s2005_s10 + $0x3a0] sm:$0xff]  ;;  %v302_v55 = vld [vmem:[%s2005_s10 + $0x3e8] sm:$0xff] }
  0xda   : > { %1170 = vmatmul.mubr.f32.gmra.mxu1 %v370_v56  ;;  %1580 = vmatprep.subr.mxu1 %v506_v57  ;;  %v301_v56 = vld [vmem:[%s2005_s10 + $0x3e0] sm:$0xff] }
  0xdb   : > { %1581 = vmatpush3.msra.mxu1 %v506_v57  ;;  %1054 = vmatprep.mubr.f32.mxu0 %v210_v58  ;;  %v309_v57 = vld [vmem:[%s2005_s10 + $0x420] sm:$0xff] }
  0xdc   : > { %1582 = vmatprep.subr.mxu1 %v505_v59  ;;  %1174 = vmatprep.mubr.f32.mxu1 %v378_v60 }
  0xdd   : > { %1583 = vmatpush3.msra.mxu1 %v505_v59  ;;  %1055 = vmatmul.mubr.f32.gmra.mxu0 %v209_v61  ;;  %v300_v61 = vld [vmem:[%s2005_s10 + $0x3d8] sm:$0xff] }
  0xde   : > { %1175 = vmatmul.mubr.f32.gmra.mxu1 %v377_v62  ;;  %1584 = vmatprep.subr.mxu1 %v504_v63 }
  0xdf   : > { %1585 = vmatpush3.msra.mxu1 %v504_v63  ;;  %1059 = vmatprep.mubr.f32.mxu0 %v217_v0  ;;  %v316_v0 = vld [vmem:[%s2005_s10 + $0x458] sm:$0xff] }
  0xe0   : > { %1586 = vmatprep.subr.mxu1 %v503_v1  ;;  %1179 = vmatprep.mubr.f32.mxu1 %v385_v3 }
  0xe1   : > { %1587 = vmatpush3.msra.mxu1 %v503_v1  ;;  %1060 = vmatmul.mubr.f32.gmra.mxu0 %v216_v4  ;;  %v308_v1 = vld [vmem:[%s2005_s10 + $0x418] sm:$0xff]  ;;  %v323_v4 = vld [vmem:[%s2005_s10 + $0x490] sm:$0xff] }
  0xe2   : > { %1180 = vmatmul.mubr.f32.gmra.mxu1 %v384_v5  ;;  %1588 = vmatprep.subr.mxu1 %v502_v6 }
  0xe3   : > { %1589 = vmatpush3.msra.mxu1 %v502_v6  ;;  %1064 = vmatprep.mubr.f32.mxu0 %v224_v7 }
  0xe4   : > { %1590 = vmatprep.subr.mxu1 %v501_v8  ;;  %1184 = vmatprep.mubr.f32.mxu1 %v392_v9 }
  0xe5   : > { %1591 = vmatpush3.msra.mxu1 %v501_v8  ;;  %1065 = vmatmul.mubr.f32.gmra.mxu0 %v223_v10  ;;  %v307_v8 = vld [vmem:[%s2005_s10 + $0x410] sm:$0xff] }
  0xe6   : > { %1185 = vmatmul.mubr.f32.gmra.mxu1 %v391_v11  ;;  %1592 = vmatprep.subr.mxu1 %v500_v12  ;;  %v330_v11 = vld [vmem:[%s2005_s10 + $0x4c8] sm:$0xff] }
  0xe7   : > { %1593 = vmatpush3.msra.mxu1 %v500_v12  ;;  %1069 = vmatprep.mubr.f32.mxu0 %v231_v13  ;;  %v315_v12 = vld [vmem:[%s2005_s10 + $0x450] sm:$0xff] }
  0xe8   : > { %1594 = vmatprep.subr.mxu1 %v499_v14  ;;  %1189 = vmatprep.mubr.f32.mxu1 %v399_v15 }
  0xe9   : > { %1595 = vmatpush3.msra.mxu1 %v499_v14  ;;  %1070 = vmatmul.mubr.f32.gmra.mxu0 %v230_v16  ;;  %v337_v14 = vld [vmem:[%s2005_s10 + $0x500] sm:$0xff] }
  0xea   : > { %1190 = vmatmul.mubr.f32.gmra.mxu1 %v398_v17  ;;  %1596 = vmatprep.subr.mxu1 %v498_v18 }
  0xeb   : > { %1597 = vmatpush3.msra.mxu1 %v498_v18  ;;  %1074 = vmatprep.mubr.f32.mxu0 %v238_v19  ;;  %v314_v18 = vld [vmem:[%s2005_s10 + $0x448] sm:$0xff] }
  0xec   : > { %1598 = vmatprep.subr.mxu1 %v497_v20  ;;  %1600 = vmatprep.mubr.f32.mxu1 %v183_v21  ;;  %v344_v21 = vld [vmem:[%s2005_s10 + $0x538] sm:$0xff] }
  0xed   : > { %1599 = vmatpush3.msra.mxu1 %v497_v20  ;;  %1075 = vmatmul.mubr.f32.gmra.mxu0 %v237_v22  ;;  %v322_v22 = vld [vmem:[%s2005_s10 + $0x488] sm:$0xff] }
  0xee   : > { %1601 = vmatmul.mubr.f32.vlgmr.msra.gmra.mxu1 %v190_v23  ;;  %1079 = vmatprep.mubr.f32.mxu0 %v245_v24  ;;  %v351_v24 = vld [vmem:[%s2005_s10 + $0x570] sm:$0xff] }
  0xef   : > { %1603 = vmatprep.mubr.f32.mxu1 %v197_v25 }
  0xf1   : > { %1080 = vmatmul.mubr.f32.gmra.mxu0 %v244_v26 }
  0xf2   : > { %1604 = vmatmul.mubr.f32.gmra.mxu1 %v204_v27  ;;  %1084 = vmatprep.mubr.f32.mxu0 %v252_v28  ;;  %v321_v28 = vld [vmem:[%s2005_s10 + $0x480] sm:$0xff] }
  0xf3   : > { %1606 = vmatprep.mubr.f32.mxu1 %v211_v29 }
  0xf5   : > { %1085 = vmatmul.mubr.f32.gmra.mxu0 %v251_v30 }
  0xf6   : > { %1607 = vmatmul.mubr.f32.gmra.mxu1 %v218_v31  ;;  %1089 = vmatprep.mubr.f32.mxu0 %v259_v32  ;;  %v358_v31 = vld [vmem:[%s2005_s10 + $0x5a8] sm:$0xff]  ;;  %v329_v32 = vld [vmem:[%s2005_s10 + $0x4c0] sm:$0xff] }
  0xf7   : > { %1609 = vmatprep.mubr.f32.mxu1 %v225_v33 }
  0xf9   : > { %1090 = vmatmul.mubr.f32.gmra.mxu0 %v258_v34  ;;  %v365_v34 = vld [vmem:[%s2005_s10 + $0x5e0] sm:$0xff] }
  0xfa   : > { %1610 = vmatmul.mubr.f32.gmra.mxu1 %v232_v35  ;;  %1094 = vmatprep.mubr.f32.mxu0 %v266_v36 }
  0xfb   : > { %1612 = vmatprep.mubr.f32.mxu1 %v239_v37 }
  0xfd   : > { %1095 = vmatmul.mubr.f32.gmra.mxu0 %v265_v38  ;;  %v328_v38 = vld [vmem:[%s2005_s10 + $0x4b8] sm:$0xff] }
  0xfe   : > { %1613 = vmatmul.mubr.f32.gmra.mxu1 %v246_v39  ;;  %1099 = vmatprep.mubr.f32.mxu0 %v273_v40 }
  0xff   : > { %1615 = vmatprep.mubr.f32.mxu1 %v253_v41  ;;  %v372_v41 = vld [vmem:[%s2005_s10 + $0x618] sm:$0xff] }
 0x101   : > { %1100 = vmatmul.mubr.f32.gmra.mxu0 %v272_v42  ;;  %v336_v42 = vld [vmem:[%s2005_s10 + $0x4f8] sm:$0xff] }
 0x102   : > { %1616 = vmatmul.mubr.f32.gmra.mxu1 %v260_v2  ;;  %1104 = vmatprep.mubr.f32.mxu0 %v280_v43  ;;  %v379_v43 = vld [vmem:[%s2005_s10 + $0x650] sm:$0xff] }
 0x103   : > { %1618 = vmatprep.mubr.f32.mxu1 %v267_v44 }
 0x105   : > { %1105 = vmatmul.mubr.f32.gmra.mxu0 %v279_v45 }
 0x106   : > { %1619 = vmatmul.mubr.f32.gmra.mxu1 %v274_v46  ;;  %1109 = vmatprep.mubr.f32.mxu0 %v287_v47  ;;  %v335_v47 = vld [vmem:[%s2005_s10 + $0x4f0] sm:$0xff] }
 0x107   : > { %1621 = vmatprep.mubr.f32.mxu1 %v281_v48 }
 0x109   : > { %1110 = vmatmul.mubr.f32.gmra.mxu0 %v286_v49 }
 0x10a   : > { %1622 = vmatmul.mubr.f32.gmra.mxu1 %v288_v50  ;;  %1114 = vmatprep.mubr.f32.mxu0 %v294_v51  ;;  %v386_v50 = vld [vmem:[%s2005_s10 + $0x688] sm:$0xff]  ;;  %v343_v51 = vld [vmem:[%s2005_s10 + $0x530] sm:$0xff] }
 0x10b   : > { %1624 = vmatprep.mubr.f32.mxu1 %v295_v52 }
 0x10d   : > { %v586_v58 = vpop.f32.mrf.mxu0  ;;  %v811_v59 = vpop.f32.mrf.mxu1  ;;  %1115 = vmatmul.mubr.f32.gmra.mxu0 %v293_v53  ;;  %v393_v53 = vld [vmem:[%s2005_s10 + $0x6c0] sm:$0xff] }
 0x10e   : > { %v587_v60 = vadd.f32 %v2431_v54, %v586_v58  ;;  %1625 = vmatmul.mubr.f32.gmra.mxu1 %v302_v55  ;;  %1119 = vmatprep.mubr.f32.mxu0 %v301_v56  ;;  %v342_v58 = vld [vmem:[%s2005_s10 + $0x528] sm:$0xff] }
 0x10f   : > { %v588_v62 = vpop.f32.mrf.mxu0  ;;  %v813_v63 = vpop.f32.mrf.mxu1  ;;  %1627 = vmatprep.mubr.f32.mxu1 %v309_v57 }
 0x110   : > { %v2440_v3 = vadd.f32 %v811_v59, %v587_v60 }
 0x111   : > { %v591_v5 = vpop.f32.mrf.mxu0  ;;  %v816_v6 = vpop.f32.mrf.mxu1  ;;  %1120 = vmatmul.mubr.f32.gmra.mxu0 %v300_v61  ;;  %v400_v61 = vld [vmem:[%s2005_s10 + $0x6f8] sm:$0xff]  ;;  %s1516_s10 = sshll.u32 %s2639_s4, 3 }
 0x112   : > { %v592_v7 = vadd.f32 %v2431_v54, %v591_v5  ;;  %1628 = vmatmul.mubr.f32.gmra.mxu1 %v316_v0  ;;  %1124 = vmatprep.mubr.f32.mxu0 %v308_v1  ;;  %s2565_s25 = scalar_lea.vmem %s2637_s3, %s1516_s10 }
 0x113   : > { %v593_v9 = vpop.f32.mrf.mxu0  ;;  %v818_v10 = vpop.f32.mrf.mxu1  ;;  %1630 = vmatprep.mubr.f32.mxu1 %v323_v4 }
 0x114   : > { %v2447_v13 = vadd.f32 %v816_v6, %v592_v7 }
 0x115   : > { %v596_v15 = vpop.f32.mrf.mxu0  ;;  %v821_v16 = vpop.f32.mrf.mxu1  ;;  %1125 = vmatmul.mubr.f32.gmra.mxu0 %v307_v8 }
 0x116   : > { %v597_v17 = vadd.f32 %v2431_v54, %v596_v15  ;;  %1631 = vmatmul.mubr.f32.gmra.mxu1 %v330_v11  ;;  %1129 = vmatprep.mubr.f32.mxu0 %v315_v12 }
 0x117   : > { %v598_v19 = vpop.f32.mrf.mxu0  ;;  %v823_v20 = vpop.f32.mrf.mxu1  ;;  %1633 = vmatprep.mubr.f32.mxu1 %v337_v14 }
 0x118   : > { %v2454_v23 = vadd.f32 %v821_v16, %v597_v17 }
 0x119   : > { %v601_v25 = vpop.f32.mrf.mxu0  ;;  %v826_v26 = vpop.f32.mrf.mxu1  ;;  %1130 = vmatmul.mubr.f32.gmra.mxu0 %v314_v18 }
 0x11a   : > { %v602_v27 = vadd.f32 %v2431_v54, %v601_v25  ;;  %1634 = vmatmul.mubr.f32.gmra.mxu1 %v344_v21  ;;  %1134 = vmatprep.mubr.f32.mxu0 %v322_v22 }
 0x11b   : > { %v603_v29 = vpop.f32.mrf.mxu0  ;;  %v828_v30 = vpop.f32.mrf.mxu1  ;;  %1636 = vmatprep.mubr.f32.mxu1 %v351_v24 }
 0x11c   : > { %v2461_v33 = vadd.f32 %v826_v26, %v602_v27 }
 0x11d   : > { %v606_v35 = vpop.f32.mrf.mxu0  ;;  %v831_v36 = vpop.f32.mrf.mxu1  ;;  %1135 = vmatmul.mubr.f32.gmra.mxu0 %v321_v28 }
 0x11e   : > { %v607_v37 = vadd.f32 %v2431_v54, %v606_v35  ;;  %1637 = vmatmul.mubr.f32.gmra.mxu1 %v358_v31  ;;  %1139 = vmatprep.mubr.f32.mxu0 %v329_v32 }
 0x11f   : > { %v608_v39 = vpop.f32.mrf.mxu0  ;;  %v833_v40 = vpop.f32.mrf.mxu1  ;;  %1639 = vmatprep.mubr.f32.mxu1 %v365_v34 }
 0x120   : > { %v2468_v2 = vadd.f32 %v831_v36, %v607_v37 }
 0x121   : > { %v611_v44 = vpop.f32.mrf.mxu0  ;;  %v836_v45 = vpop.f32.mrf.mxu1  ;;  %1140 = vmatmul.mubr.f32.gmra.mxu0 %v328_v38 }
 0x122   : > { %v612_v46 = vadd.f32 %v2431_v54, %v611_v44  ;;  %1640 = vmatmul.mubr.f32.gmra.mxu1 %v372_v41  ;;  %1144 = vmatprep.mubr.f32.mxu0 %v336_v42 }
 0x123   : > { %v613_v48 = vpop.f32.mrf.mxu0  ;;  %v838_v49 = vpop.f32.mrf.mxu1  ;;  %1642 = vmatprep.mubr.f32.mxu1 %v379_v43 }
 0x124   : > { %v2475_v52 = vadd.f32 %v836_v45, %v612_v46 }
 0x125   : > { %v616_v55 = vpop.f32.mrf.mxu0  ;;  %v841_v56 = vpop.f32.mrf.mxu1  ;;  %1145 = vmatmul.mubr.f32.gmra.mxu0 %v335_v47 }
 0x126   : > { %v617_v57 = vadd.f32 %v2431_v54, %v616_v55  ;;  %1643 = vmatmul.mubr.f32.gmra.mxu1 %v386_v50  ;;  %1149 = vmatprep.mubr.f32.mxu0 %v343_v51 }
 0x127   : > { %v618_v59 = vpop.f32.mrf.mxu0  ;;  %v843_v60 = vpop.f32.mrf.mxu1  ;;  %1645 = vmatprep.mubr.f32.mxu1 %v393_v53 }
 0x128   : > { %v2481_v62 = vadd.f32 %v841_v56, %v617_v57 }
 0x129   : > { %v621_v63 = vpop.f32.mrf.mxu0  ;;  %v846_v0 = vpop.f32.mrf.mxu1  ;;  %1150 = vmatmul.mubr.f32.gmra.mxu0 %v342_v58 }
 0x12a   : > { %v622_v1 = vadd.f32 %v2431_v54, %v621_v63  ;;  %1646 = vmatmul.mubr.f32.gmra.mxu1 %v400_v61 }
 0x12b   : > { %v623_v4 = vpop.f32.mrf.mxu0  ;;  %v848_v5 = vpop.f32.mrf.mxu1 }
 0x12c   : > { %v2484_v6 = vadd.f32 %v846_v0, %v622_v1 }
 0x12d   : > { %v626_v7 = vpop.f32.mrf.mxu0  ;;  %v851_v8 = vpop.f32.mrf.mxu1 }
 0x12e   : > { %v627_v9 = vadd.f32 %v2431_v54, %v626_v7 }
 0x12f   : > { %v628_v10 = vpop.f32.mrf.mxu0  ;;  %v853_v11 = vpop.f32.mrf.mxu1 }
 0x130   : > { %v2487_v12 = vadd.f32 %v851_v8, %v627_v9 }
 0x131   : > { %v631_v14 = vpop.f32.mrf.mxu0  ;;  %v856_v15 = vpop.f32.mrf.mxu1 }
 0x132   : > { %v632_v16 = vadd.f32 %v2431_v54, %v631_v14 }
 0x133   : > { %v633_v17 = vpop.f32.mrf.mxu0  ;;  %v858_v18 = vpop.f32.mrf.mxu1 }
 0x134   : > { %v2490_v19 = vadd.f32 %v856_v15, %v632_v16 }
 0x135   : > { %v636_v20 = vpop.f32.mrf.mxu0  ;;  %v861_v21 = vpop.f32.mrf.mxu1 }
 0x136   : > { %v637_v22 = vadd.f32 %v2431_v54, %v636_v20 }
 0x137   : > { %v638_v24 = vpop.f32.mrf.mxu0  ;;  %v863_v25 = vpop.f32.mrf.mxu1 }
 0x138   : > { %v2493_v26 = vadd.f32 %v861_v21, %v637_v22 }
 0x139   : > { %v641_v27 = vpop.f32.mrf.mxu0  ;;  %v866_v28 = vpop.f32.mrf.mxu1 }
 0x13a   : > { %v642_v29 = vadd.f32 %v2431_v54, %v641_v27 }
 0x13b   : > { %v643_v30 = vpop.f32.mrf.mxu0  ;;  %v868_v31 = vpop.f32.mrf.mxu1 }
 0x13c   : > { %v2496_v32 = vadd.f32 %v866_v28, %v642_v29 }
 0x13d   : > { %v646_v34 = vpop.f32.mrf.mxu0  ;;  %v871_v35 = vpop.f32.mrf.mxu1 }
 0x13e   : > { %v647_v36 = vadd.f32 %v2431_v54, %v646_v34 }
 0x13f   : > { %v648_v37 = vpop.f32.mrf.mxu0  ;;  %v873_v38 = vpop.f32.mrf.mxu1 }
 0x140   : > { %v2499_v39 = vadd.f32 %v871_v35, %v647_v36 }
 0x141   : > { %v651_v40 = vpop.f32.mrf.mxu0  ;;  %v876_v41 = vpop.f32.mrf.mxu1 }
 0x142   : > { %v652_v42 = vadd.f32 %v2431_v54, %v651_v40 }
 0x143   : > { %v653_v43 = vpop.f32.mrf.mxu0  ;;  %v878_v44 = vpop.f32.mrf.mxu1 }
 0x144   : > { %v2502_v45 = vadd.f32 %v876_v41, %v652_v42 }
 0x145   : > { %v656_v46 = vpop.f32.mrf.mxu0  ;;  %v881_v47 = vpop.f32.mrf.mxu1 }
 0x146   : > { %v657_v48 = vadd.f32 %v2431_v54, %v656_v46 }
 0x147   : > { %v658_v49 = vpop.f32.mrf.mxu0  ;;  %v883_v50 = vpop.f32.mrf.mxu1 }
 0x148   : > { %v2505_v51 = vadd.f32 %v881_v47, %v657_v48 }
 0x149   : > { %v661_v53 = vpop.f32.mrf.mxu0  ;;  %v886_v55 = vpop.f32.mrf.mxu1 }
 0x14a   : > { %v662_v56 = vadd.f32 %v2431_v54, %v661_v53 }
 0x14b   : > { %v663_v57 = vpop.f32.mrf.mxu0  ;;  %v888_v58 = vpop.f32.mrf.mxu1 }
 0x14c   : > { %v2508_v59 = vadd.f32 %v886_v55, %v662_v56 }
 0x14d   : > { %v666_v60 = vpop.f32.mrf.mxu0  ;;  %v891_v61 = vpop.f32.mrf.mxu1 }
 0x14e   : > { %v667_v63 = vadd.f32 %v2431_v54, %v666_v60 }
 0x14f   : > { %v668_v0 = vpop.f32.mrf.mxu0  ;;  %v893_v1 = vpop.f32.mrf.mxu1 }
 0x150   : > { %v2511_v4 = vadd.f32 %v891_v61, %v667_v63 }
 0x151   : > { %v671_v5 = vpop.f32.mrf.mxu0  ;;  %v896_v7 = vpop.f32.mrf.mxu1 }
 0x152   : > { %v672_v8 = vadd.f32 %v2431_v54, %v671_v5 }
 0x153   : > { %v673_v9 = vpop.f32.mrf.mxu0  ;;  %v898_v10 = vpop.f32.mrf.mxu1 }
 0x154   : > { %v2514_v11 = vadd.f32 %v896_v7, %v672_v8 }
 0x155   : > { %v676_v14 = vpop.f32.mrf.mxu0  ;;  %v901_v15 = vpop.f32.mrf.mxu1 }
 0x156   : > { %v677_v16 = vadd.f32 %v2431_v54, %v676_v14 }
 0x157   : > { %v678_v17 = vpop.f32.mrf.mxu0  ;;  %v903_v18 = vpop.f32.mrf.mxu1 }
 0x158   : > { %v2517_v20 = vadd.f32 %v901_v15, %v677_v16 }
 0x159   : > { %v681_v21 = vpop.f32.mrf.mxu0  ;;  %v906_v22 = vpop.f32.mrf.mxu1 }
 0x15a   : > { %v682_v24 = vadd.f32 %v2431_v54, %v681_v21 }
 0x15b   : > { %v683_v25 = vpop.f32.mrf.mxu0  ;;  %v908_v27 = vpop.f32.mrf.mxu1 }
 0x15c   : > { %v2520_v28 = vadd.f32 %v906_v22, %v682_v24 }
 0x15d   : > { %v686_v29 = vpop.f32.mrf.mxu0  ;;  %v911_v30 = vpop.f32.mrf.mxu1 }
 0x15e   : > { %v687_v31 = vadd.f32 %v2431_v54, %v686_v29 }
 0x15f   : > { %v688_v34 = vpop.f32.mrf.mxu0  ;;  %v913_v35 = vpop.f32.mrf.mxu1 }
 0x160   : > { %v2523_v36 = vadd.f32 %v911_v30, %v687_v31 }
 0x161   : > { %v691_v37 = vpop.f32.mrf.mxu0  ;;  %v916_v38 = vpop.f32.mrf.mxu1 }
 0x162   : > { %v692_v40 = vadd.f32 %v2431_v54, %v691_v37 }
 0x163   : > { %v693_v41 = vpop.f32.mrf.mxu0  ;;  %v918_v42 = vpop.f32.mrf.mxu1 }
 0x164   : > { %v2526_v43 = vadd.f32 %v916_v38, %v692_v40 }
 0x165   : > { %v696_v44 = vpop.f32.mrf.mxu0  ;;  %v921_v46 = vpop.f32.mrf.mxu1 }
 0x166   : > { %v697_v47 = vadd.f32 %v2431_v54, %v696_v44 }
 0x167   : > { %v698_v48 = vpop.f32.mrf.mxu0  ;;  %v923_v49 = vpop.f32.mrf.mxu1 }
 0x168   : > { %v2529_v50 = vadd.f32 %v921_v46, %v697_v47 }
 0x169   : > { %v701_v53 = vpop.f32.mrf.mxu0  ;;  %v926_v55 = vpop.f32.mrf.mxu1 }
 0x16a   : > { %v702_v56 = vadd.f32 %v2431_v54, %v701_v53 }
 0x16b   : > { %v703_v57 = vpop.f32.mrf.mxu0  ;;  %v928_v58 = vpop.f32.mrf.mxu1 }
 0x16c   : > { %v2532_v60 = vadd.f32 %v926_v55, %v702_v56 }
 0x16d   : > { %v706_v61 = vpop.f32.mrf.mxu0  ;;  %v931_v63 = vpop.f32.mrf.mxu1 }
 0x16e   : > { %v707_v0 = vadd.f32 %v2431_v54, %v706_v61 }
 0x16f   : > { %v708_v1 = vpop.f32.mrf.mxu0  ;;  %v933_v5 = vpop.f32.mrf.mxu1 }
 0x170   : > { %v932_v7 = vadd.f32 %v931_v63, %v707_v0 }
 0x171   : > { %v711_v8 = vpop.f32.mrf.mxu0  ;;  %v936_v9 = vpop.f32.mrf.mxu1 }
 0x172   : > { %v712_v10 = vadd.f32 %v2431_v54, %v711_v8 }
 0x173   : > { %v713_v14 = vpop.f32.mrf.mxu0  ;;  %v938_v15 = vpop.f32.mrf.mxu1 }
 0x174   : > { %v937_v16 = vadd.f32 %v936_v9, %v712_v10 }
 0x175   : > { %v716_v17 = vpop.f32.mrf.mxu0  ;;  %v941_v18 = vpop.f32.mrf.mxu1 }
 0x176   : > { %v717_v21 = vadd.f32 %v2431_v54, %v716_v17 }
 0x177   : > { %v718_v22 = vpop.f32.mrf.mxu0  ;;  %v943_v24 = vpop.f32.mrf.mxu1 }
 0x178   : > { %v942_v25 = vadd.f32 %v941_v18, %v717_v21 }
 0x179   : > { %v721_v27 = vpop.f32.mrf.mxu0  ;;  %v946_v29 = vpop.f32.mrf.mxu1 }
 0x17a   : > { %v722_v30 = vadd.f32 %v2431_v54, %v721_v27 }
 0x17b   : > { %v723_v31 = vpop.f32.mrf.mxu0  ;;  %v948_v34 = vpop.f32.mrf.mxu1 }
 0x17c   : > { %v947_v35 = vadd.f32 %v946_v29, %v722_v30 }
 0x17d   : > { %v726_v37 = vpop.f32.mrf.mxu0  ;;  %v951_v38 = vpop.f32.mrf.mxu1 }
 0x17e   : > { %v727_v40 = vadd.f32 %v2431_v54, %v726_v37 }
 0x17f   : > { %v728_v41 = vpop.f32.mrf.mxu0  ;;  %v953_v42 = vpop.f32.mrf.mxu1 }
 0x180   : > { %v952_v44 = vadd.f32 %v951_v38, %v727_v40 }
 0x181   : > { %v731_v46 = vpop.f32.mrf.mxu0  ;;  %v956_v47 = vpop.f32.mrf.mxu1 }
 0x182   : > { %v732_v48 = vadd.f32 %v2431_v54, %v731_v46 }
 0x183   : > { %v733_v49 = vpop.f32.mrf.mxu0  ;;  %v958_v53 = vpop.f32.mrf.mxu1 }
 0x184   : > { %v957_v55 = vadd.f32 %v956_v47, %v732_v48 }
 0x185   : > { %v736_v56 = vpop.f32.mrf.mxu0  ;;  %v961_v57 = vpop.f32.mrf.mxu1 }
 0x186   : > { %v737_v58 = vadd.f32 %v2431_v54, %v736_v56 }
 0x187   : > { %v738_v61 = vpop.f32.mrf.mxu0  ;;  %v963_v63 = vpop.f32.mrf.mxu1 }
 0x188   : > { %v962_v0 = vadd.f32 %v961_v57, %v737_v58 }
 0x189   : > { %v741_v1 = vpop.f32.mrf.mxu0  ;;  %v966_v5 = vpop.f32.mrf.mxu1 }
 0x18a   : > { %v742_v8 = vadd.f32 %v2431_v54, %v741_v1 }
 0x18b   : > { %v743_v9 = vpop.f32.mrf.mxu0  ;;  %v968_v10 = vpop.f32.mrf.mxu1 }
 0x18c   : > { %v2542_v14 = vadd.f32 %v966_v5, %v742_v8 }
 0x18d   : > { %v1036_v15 = vpop.f32.mrf.mxu0  ;;  %v1156_v17 = vpop.f32.mrf.mxu1 }
 0x18e   : > { %v2544_v18 = vadd.f32 %v1156_v17, %v932_v7 }
 0x18f   : > { %v1038_v21 = vpop.f32.mrf.mxu0  ;;  %v1158_v22 = vpop.f32.mrf.mxu1 }
 0x191   : > { %v1041_v24 = vpop.f32.mrf.mxu0 }
 0x192   : > { %v1161_v27 = vpop.f32.mrf.mxu1  ;;  %v1042_v22 = vadd.f32 %v1041_v24, %v2447_v13 }
 0x193   : > { %v2546_v29 = vadd.f32 %v1161_v27, %v937_v16  ;;  %v1043_v30 = vpop.f32.mrf.mxu0 }
 0x194   : > { %v1163_v31 = vpop.f32.mrf.mxu1 }
 0x195   : > { %v1046_v34 = vpop.f32.mrf.mxu0 }
 0x196   : > { %v1166_v37 = vpop.f32.mrf.mxu1 }
 0x197   : > { %v2548_v38 = vadd.f32 %v1166_v37, %v942_v25  ;;  %v1048_v54 = vpop.f32.mrf.mxu0 }
 0x198   : > { %v1168_v40 = vpop.f32.mrf.mxu1 }
 0x199   : > { %v1051_v41 = vpop.f32.mrf.mxu0 }
 0x19a   : > { %v1171_v42 = vpop.f32.mrf.mxu1  ;;  %v1052_v54 = vadd.f32 %v1051_v41, %v2461_v33 }
 0x19b   : > { %v2550_v46 = vadd.f32 %v1171_v42, %v947_v35  ;;  %v1053_v7 = vpop.f32.mrf.mxu0  ;;  %v1047_v42 = vadd.f32 %v1046_v34, %v2454_v23 }
 0x19c   : > { %v1173_v47 = vpop.f32.mrf.mxu1 }
 0x19d   : > { %v1056_v48 = vpop.f32.mrf.mxu0 }
 0x19e   : > { %v1176_v49 = vpop.f32.mrf.mxu1  ;;  %v1057_v33 = vadd.f32 %v1056_v48, %v2468_v2 }
 0x19f   : > { %v2552_v53 = vadd.f32 %v1176_v49, %v952_v44  ;;  %v1058_v16 = vpop.f32.mrf.mxu0 }
 0x1a0   : > { %v1178_v56 = vpop.f32.mrf.mxu1 }
 0x1a1   : > { %v1061_v57 = vpop.f32.mrf.mxu0 }
 0x1a2   : > { %v1181_v58 = vpop.f32.mrf.mxu1  ;;  %v1062_v16 = vadd.f32 %v1061_v57, %v2475_v52 }
 0x1a3   : > { %v2554_v61 = vadd.f32 %v1181_v58, %v957_v55  ;;  %v1063_v25 = vpop.f32.mrf.mxu0 }
 0x1a4   : > { %v1183_v63 = vpop.f32.mrf.mxu1 }
 0x1a5   : > { %v1066_v1 = vpop.f32.mrf.mxu0 }
 0x1a6   : > { %v1186_v5 = vpop.f32.mrf.mxu1  ;;  %v1067_v52 = vadd.f32 %v1066_v1, %v2481_v62 }
 0x1a7   : > { %v2556_v8 = vadd.f32 %v1186_v5, %v962_v0  ;;  %v1068_v35 = vpop.f32.mrf.mxu0  ;;  %v1037_v0 = vadd.f32 %v1036_v15, %v2440_v3 }
 0x1a8   : > { %v1188_v9 = vpop.f32.mrf.mxu1 }
 0x1a9   : > { %v1071_v10 = vpop.f32.mrf.mxu0 }
 0x1aa   : > { %v2558_v17 = vpop.f32.mrf.mxu1  ;;  %v1072_v23 = vadd.f32 %v1071_v10, %v2484_v6 }
 0x1ab   : > { %v1073_v44 = vpop.f32.mrf.mxu0 }
 0x1ac   : > { %v1193_v21 = vpop.f32.mrf.mxu1 }
 0x1ad   : > { %v1076_v27 = vpop.f32.mrf.mxu0 }
 0x1ae   : > { %v1602_v55 = vpop.f32.mrf.mxu1  ;;  %v1077_v6 = vadd.f32 %v1076_v27, %v2487_v12 }
 0x1af   : > { %v1267_v30 = vadd.f32 %v1602_v55, %v1042_v22  ;;  %v1078_v31 = vpop.f32.mrf.mxu0 }
 0x1b0   : > { %v1261_v37 = vpop.f32.mrf.mxu1 }
 0x1b1   : > { %1421 = vst [vmem:[%s2565_s25 + $0x8] sm:$0xff] %v1267_v30  ;;  %v1262_v13 = vadd.f32 %v1261_v37, %v1037_v0  ;;  %v1081_v24 = vpop.f32.mrf.mxu0 }
 0x1b2   : > { %v1605_v40 = vpop.f32.mrf.mxu1  ;;  %v1082_v2 = vadd.f32 %v1081_v24, %v2490_v19 }
 0x1b3   : > { %1420 = vst [vmem:[%s2565_s25] sm:$0xff] %v1262_v13  ;;  %v1277_v7 = vadd.f32 %v1605_v40, %v1052_v54  ;;  %v1083_v47 = vpop.f32.mrf.mxu0 }
 0x1b4   : > { %v1271_v49 = vpop.f32.mrf.mxu1 }
 0x1b5   : > { %1423 = vst [vmem:[%s2565_s25 + $0x18] sm:$0xff] %v1277_v7  ;;  %v1272_v3 = vadd.f32 %v1271_v49, %v1047_v42  ;;  %v1086_v15 = vpop.f32.mrf.mxu0 }
 0x1b6   : > { %v1608_v56 = vpop.f32.mrf.mxu1  ;;  %v1087_v19 = vadd.f32 %v1086_v15, %v2493_v26 }
 0x1b7   : > { %1422 = vst [vmem:[%s2565_s25 + $0x10] sm:$0xff] %v1272_v3  ;;  %v1287_v41 = vadd.f32 %v1608_v56, %v1062_v16  ;;  %v1088_v58 = vpop.f32.mrf.mxu0 }
 0x1b8   : > { %v1281_v25 = vpop.f32.mrf.mxu1 }
 0x1b9   : > { %1425 = vst [vmem:[%s2565_s25 + $0x28] sm:$0xff] %v1287_v41  ;;  %v1282_v34 = vadd.f32 %v1281_v25, %v1057_v33  ;;  %v1091_v63 = vpop.f32.mrf.mxu0 }
 0x1ba   : > { %v1611_v5 = vpop.f32.mrf.mxu1  ;;  %v1092_v62 = vadd.f32 %v1091_v63, %v2496_v32 }
 0x1bb   : > { %1424 = vst [vmem:[%s2565_s25 + $0x20] sm:$0xff] %v1282_v34  ;;  %v1297_v57 = vadd.f32 %v1611_v5, %v1072_v23  ;;  %v1093_v35 = vpop.f32.mrf.mxu0 }
 0x1bc   : > { %v1291_v9 = vpop.f32.mrf.mxu1 }
 0x1bd   : > { %1427 = vst [vmem:[%s2565_s25 + $0x38] sm:$0xff] %v1297_v57  ;;  %v1292_v48 = vadd.f32 %v1291_v9, %v1067_v52  ;;  %v1096_v44 = vpop.f32.mrf.mxu0 }
 0x1be   : > { %v1614_v21 = vpop.f32.mrf.mxu1  ;;  %v1097_v32 = vadd.f32 %v1096_v44, %v2499_v39 }
 0x1bf   : > { %1426 = vst [vmem:[%s2565_s25 + $0x30] sm:$0xff] %v1292_v48  ;;  %v1307_v10 = vadd.f32 %v1614_v21, %v1082_v2  ;;  %v1098_v22 = vpop.f32.mrf.mxu0 }
 0x1c0   : > { %v1301_v55 = vpop.f32.mrf.mxu1 }
 0x1c1   : > { %1429 = vst [vmem:[%s2565_s25 + $0x48] sm:$0xff] %v1307_v10  ;;  %v1302_v1 = vadd.f32 %v1301_v55, %v1077_v6  ;;  %v1101_v0 = vpop.f32.mrf.mxu0 }
 0x1c2   : > { %v1617_v30 = vpop.f32.mrf.mxu1  ;;  %v1102_v12 = vadd.f32 %v1101_v0, %v2502_v45 }
 0x1c3   : > { %1428 = vst [vmem:[%s2565_s25 + $0x40] sm:$0xff] %v1302_v1  ;;  %v1317_v31 = vadd.f32 %v1617_v30, %v1092_v62  ;;  %v1103_v37 = vpop.f32.mrf.mxu0 }
 0x1c4   : > { %v1311_v54 = vpop.f32.mrf.mxu1 }
 0x1c5   : > { %1431 = vst [vmem:[%s2565_s25 + $0x58] sm:$0xff] %v1317_v31  ;;  %v1312_v27 = vadd.f32 %v1311_v54, %v1087_v19  ;;  %v1106_v13 = vpop.f32.mrf.mxu0 }
 0x1c6   : > { %v1620_v24 = vpop.f32.mrf.mxu1  ;;  %v1107_v45 = vadd.f32 %v1106_v13, %v2505_v51 }
 0x1c7   : > { %1430 = vst [vmem:[%s2565_s25 + $0x50] sm:$0xff] %v1312_v27  ;;  %v1327_v40 = vadd.f32 %v1620_v24, %v1102_v12  ;;  %v1108_v42 = vpop.f32.mrf.mxu0 }
 0x1c8   : > { %v1321_v7 = vpop.f32.mrf.mxu1 }
 0x1c9   : > { %1433 = vst [vmem:[%s2565_s25 + $0x68] sm:$0xff] %v1327_v40  ;;  %v1322_v26 = vadd.f32 %v1321_v7, %v1097_v32  ;;  %v1111_v47 = vpop.f32.mrf.mxu0 }
 0x1ca   : > { %v1112_v49 = vadd.f32 %v1111_v47, %v2508_v59  ;;  %v1623_v16 = vpop.f32.mrf.mxu1 }
 0x1cb   : > { %1432 = vst [vmem:[%s2565_s25 + $0x60] sm:$0xff] %v1322_v26  ;;  %v1113_v3 = vpop.f32.mrf.mxu0  ;;  %v1192_v26 = vadd.f32 %v2558_v17, %v2542_v14 }
 0x1cc   : > { %v1337_v15 = vadd.f32 %v1623_v16, %v1112_v49  ;;  %v1331_v56 = vpop.f32.mrf.mxu1 }
 0x1cd   : > { %v1332_v39 = vadd.f32 %v1331_v56, %v1107_v45  ;;  %v1116_v33 = vpop.f32.mrf.mxu0 }
 0x1ce   : > { %1435 = vst [vmem:[%s2565_s25 + $0x78] sm:$0xff] %v1337_v15  ;;  %v1117_v41 = vadd.f32 %v1116_v33, %v2511_v4  ;;  %v1626_v58 = vpop.f32.mrf.mxu1 }
 0x1cf   : > { %1434 = vst [vmem:[%s2565_s25 + $0x70] sm:$0xff] %v1332_v39  ;;  %v1118_v25 = vpop.f32.mrf.mxu0 }
 0x1d0   : > { %v1341_v23 = vpop.f32.mrf.mxu1 }
 0x1d1   : > { %v1342_v34 = vadd.f32 %v1341_v23, %v1117_v41  ;;  %v1121_v59 = vpop.f32.mrf.mxu0 }
 0x1d2   : > { %v1122_v51 = vadd.f32 %v1121_v59, %v2514_v11  ;;  %v1629_v63 = vpop.f32.mrf.mxu1 }
 0x1d3   : > { %1436 = vst [vmem:[%s2565_s25 + $0x80] sm:$0xff] %v1342_v34  ;;  %v1123_v5 = vpop.f32.mrf.mxu0 }
 0x1d4   : > { %v1347_v52 = vadd.f32 %v1626_v58, %v1122_v51  ;;  %v1351_v57 = vpop.f32.mrf.mxu1 }
 0x1d5   : > { %v1126_v35 = vpop.f32.mrf.mxu0 }
 0x1d6   : > { %1437 = vst [vmem:[%s2565_s25 + $0x88] sm:$0xff] %v1347_v52  ;;  %v1127_v9 = vadd.f32 %v1126_v35, %v2517_v20  ;;  %v1632_v4 = vpop.f32.mrf.mxu1 }
 0x1d7   : > { %v1128_v2 = vpop.f32.mrf.mxu0 }
 0x1d8   : > { %v1352_v48 = vadd.f32 %v1351_v57, %v1127_v9  ;;  %v1361_v44 = vpop.f32.mrf.mxu1 }
 0x1d9   : > { %v1131_v21 = vpop.f32.mrf.mxu0 }
 0x1da   : > { %1438 = vst [vmem:[%s2565_s25 + $0x90] sm:$0xff] %v1352_v48  ;;  %v1132_v6 = vadd.f32 %v1131_v21, %v2520_v28  ;;  %v1635_v11 = vpop.f32.mrf.mxu1 }
 0x1db   : > { %v1133_v10 = vpop.f32.mrf.mxu0 }
 0x1dc   : > { %v1357_v22 = vadd.f32 %v1629_v63, %v1132_v6  ;;  %v1371_v55 = vpop.f32.mrf.mxu1 }
 0x1dd   : > { %v1136_v62 = vpop.f32.mrf.mxu0 }
 0x1de   : > { %1439 = vst [vmem:[%s2565_s25 + $0x98] sm:$0xff] %v1357_v22  ;;  %v1137_v1 = vadd.f32 %v1136_v62, %v2523_v36  ;;  %v1638_v20 = vpop.f32.mrf.mxu1 }
 0x1df   : > { %v1387_v0 = vadd.f32 %v1638_v20, %v2546_v29  ;;  %v1138_v30 = vpop.f32.mrf.mxu0 }
 0x1e0   : > { %v1362_v19 = vadd.f32 %v1361_v44, %v1137_v1  ;;  %v1381_v31 = vpop.f32.mrf.mxu1 }
 0x1e1   : > { %1445 = vst [vmem:[%s2565_s25 + $0xc8] sm:$0xff] %v1387_v0  ;;  %v1382_v28 = vadd.f32 %v1381_v31, %v2544_v18  ;;  %v1141_v37 = vpop.f32.mrf.mxu0 }
 0x1e2   : > { %1440 = vst [vmem:[%s2565_s25 + $0xa0] sm:$0xff] %v1362_v19  ;;  %v1142_v54 = vadd.f32 %v1141_v37, %v2526_v43  ;;  %v1641_v12 = vpop.f32.mrf.mxu1 }
 0x1e3   : > { %1444 = vst [vmem:[%s2565_s25 + $0xc0] sm:$0xff] %v1382_v28  ;;  %v1397_v36 = vadd.f32 %v1641_v12, %v2550_v46  ;;  %v1143_v27 = vpop.f32.mrf.mxu0 }
 0x1e4   : > { %v1367_v13 = vadd.f32 %v1632_v4, %v1142_v54  ;;  %v1391_v29 = vpop.f32.mrf.mxu1 }
 0x1e5   : > { %1447 = vst [vmem:[%s2565_s25 + $0xd8] sm:$0xff] %v1397_v36  ;;  %v1392_v24 = vadd.f32 %v1391_v29, %v2548_v38  ;;  %v1146_v32 = vpop.f32.mrf.mxu0 }
 0x1e6   : > { %1441 = vst [vmem:[%s2565_s25 + $0xa8] sm:$0xff] %v1367_v13  ;;  %v1147_v18 = vadd.f32 %v1146_v32, %v2529_v50  ;;  %v1644_v40 = vpop.f32.mrf.mxu1 }
 0x1e7   : > { %1446 = vst [vmem:[%s2565_s25 + $0xd0] sm:$0xff] %v1392_v24  ;;  %v1407_v43 = vadd.f32 %v1644_v40, %v2554_v61  ;;  %v1148_v42 = vpop.f32.mrf.mxu0 }
 0x1e8   : > { %v1372_v46 = vadd.f32 %v1371_v55, %v1147_v18  ;;  %v1401_v7 = vpop.f32.mrf.mxu1 }
 0x1e9   : > { %1449 = vst [vmem:[%s2565_s25 + $0xe8] sm:$0xff] %v1407_v43  ;;  %v1402_v38 = vadd.f32 %v1401_v7, %v2552_v53  ;;  %v1151_v47 = vpop.f32.mrf.mxu0 }
 0x1ea   : > { %1442 = vst [vmem:[%s2565_s25 + $0xb0] sm:$0xff] %v1372_v46  ;;  %v1152_v50 = vadd.f32 %v1151_v47, %v2532_v60  ;;  %v1647_v49 = vpop.f32.mrf.mxu1 }
 0x1eb   : > { %1448 = vst [vmem:[%s2565_s25 + $0xe0] sm:$0xff] %v1402_v38  ;;  %v1417_v16 = vadd.f32 %v1647_v49, %v1192_v26  ;;  %v1153_v61 = vpop.f32.mrf.mxu0 }
 0x1ec   : > { %v1377_v45 = vadd.f32 %v1635_v11, %v1152_v50  ;;  %v1411_v3 = vpop.f32.mrf.mxu1 }
 0x1ed   : > { %1451 = vst [vmem:[%s2565_s25 + $0xf8] sm:$0xff] %v1417_v16  ;;  %v1412_v15 = vadd.f32 %v1411_v3, %v2556_v8 }
 0x1ee   : > { %1443 = vst [vmem:[%s2565_s25 + $0xb8] sm:$0xff] %v1377_v45 }
 0x1ef   : > { %1450 = vst [vmem:[%s2565_s25 + $0xf0] sm:$0xff] %v1412_v15 }
 0x1f0 PF: > { %s13_s12 = sadd.s32 1, %s1728_s12  }
 0x1f1   : > { %p10_p4 = scmp.ge.s32.totalorder %s13_s12, 4  }
 0x1f3   :  { %12 = sbr.rel (!%p10_p4) target bundleno = 1 (0x1), region = 62 }

</bundles_post_ra>
